<compile_context>
chip_gen: v7x
topology: tpu7x:2x2x1
jax: 0.10.0
libtpu: 0.0.40
codegen_flags: <defaults>
</compile_context>

<pallas_src>
import functools

import jax
import jax.numpy as jnp
import numpy as np
from jax.experimental import pallas as pl
from jax.experimental.pallas import tpu as pltpu


def _round_up(x, m):
    return (x + m - 1) // m * m


# ---------------------------------------------------------------------------
# Fused kernel: per sample, build patches^T in VMEM, one matmul + bias + sigmoid
# self-gating.  Output layout is (N, Cout_pad, OH*OW) -> already channel-second.
# ---------------------------------------------------------------------------
def _fused_convt_silu(xd, w_mat, b_col, *, cin, kh, kw, oh, ow):
    n = xd.shape[0]
    hd, wd = xd.shape[2], xd.shape[3]
    cout_pad, k = w_mat.shape
    ohw = oh * ow

    def kernel(xd_ref, w_ref, b_ref, v4_ref, v3_ref, p_ref):
        # Assemble patches^T (K, OH*OW) in a VMEM scratch from shifted windows
        # of the dilated input (no im2col matrix in HBM).  All slices static.
        for ikh in range(kh):
            for ikw in range(kw):
                r0 = (ikh * kw + ikw) * cin
                for ioh in range(oh):
                    p_ref[r0:r0 + cin, ioh * ow:(ioh + 1) * ow] = (
                        xd_ref[0, :, ikh + ioh, ikw:ikw + ow].astype(jnp.float32))

        # Single-shot GEMM (no K grid axis / accumulator scratch needed since
        # K = Cin*KH*KW fits one step); bias folded directly into the result.
        v2 = jnp.dot(w_ref[...], p_ref[...],
                     preferred_element_type=jnp.float32) + b_ref[...]
        # sigmoid = 1 / (1 + exp(-v2)); exp + approx reciprocal ride the EUP.
        v3 = pl.reciprocal(1.0 + jnp.exp(-v2), approx=True)
        v3_ref[0] = v3
        v4_ref[0] = v2 * v3
        # TODO(synk): at large shapes, emit v3/v4 as bf16 and switch the MXU
        # operands to bf16 to halve HBM writeback; kept f32 to match torch.

    v4, v3 = pl.pallas_call(
        kernel,
        out_shape=(
            jax.ShapeDtypeStruct((n, cout_pad, ohw), jnp.float32),
            jax.ShapeDtypeStruct((n, cout_pad, ohw), jnp.float32),
        ),
        grid_spec=pltpu.PrefetchScalarGridSpec(
            num_scalar_prefetch=0,
            grid=(n,),  # one sample per step; extent >= 2 for megacore/v7x
            in_specs=[
                pl.BlockSpec((1, cin, hd, wd), lambda i: (i, 0, 0, 0)),
                pl.BlockSpec((cout_pad, k), lambda i: (0, 0)),
                pl.BlockSpec((cout_pad, 1), lambda i: (0, 0)),
            ],
            out_specs=(
                pl.BlockSpec((1, cout_pad, ohw), lambda i: (i, 0, 0)),
                pl.BlockSpec((1, cout_pad, ohw), lambda i: (i, 0, 0)),
            ),
            scratch_shapes=[pltpu.VMEM((k, ohw), jnp.float32)],
        ),
        compiler_params=pltpu.CompilerParams(
            dimension_semantics=("parallel",),
            vmem_limit_bytes=16 * 1024 * 1024,  # tiles here are a few tens of KiB
        ),
    )(xd, w_mat, b_col)
    return v4, v3


def _dilate_pad(x, KH, KW, stride, pad):
    """Zero-dilate (stride) + zero-pad (KH-1-pad) the input; this (small, ~4x x)
    tensor is the only HBM intermediate - the patch expansion happens in VMEM."""
    N, Cin, H, W = x.shape
    OH = (H - 1) * stride - 2 * pad + KH
    OW = (W - 1) * stride - 2 * pad + KW
    off_h, off_w = KH - 1 - pad, KW - 1 - pad
    Hd = (H - 1) * stride + 1 + 2 * off_h
    Wd = (W - 1) * stride + 1 + 2 * off_w
    xd = jnp.zeros((N, Cin, Hd, Wd), x.dtype)
    xd = xd.at[:, :, off_h:off_h + (H - 1) * stride + 1:stride,
               off_w:off_w + (W - 1) * stride + 1:stride].set(x)
    return xd, (OH, OW)


@functools.partial(jax.jit, static_argnames=("stride", "pad"))
def model_forward(x, w1, b1, w2, b2, *, stride=2, pad=1):
    """Returns (v4, v3), matching Model.forward."""
    del w1, b1  # v1 = conv_transpose_1(x) is never used by the forward.
    N = x.shape[0]
    Cin, Cout, KH, KW = w2.shape

    # Compact bf16 input stream for the dilated image (review item 5).
    xd, (OH, OW) = _dilate_pad(x.astype(jnp.bfloat16), KH, KW, stride, pad)

    Cout_pad = _round_up(Cout, 8)
    K = Cin * KH * KW
    # W_mat[co, (kh*KW + kw)*Cin + ci] = w2[ci, co, KH-1-kh, KW-1-kw]  (flipped)
    w_f = w2[:, :, ::-1, ::-1].astype(jnp.float32)
    w_mat = jnp.transpose(w_f, (1, 2, 3, 0)).reshape(Cout, K)
    w_pad = jnp.zeros((Cout_pad, K), jnp.float32).at[:Cout].set(w_mat)
    b_col = jnp.zeros((Cout_pad, 1), jnp.float32).at[:Cout, 0].set(
        b2.astype(jnp.float32))

    v4_flat, v3_flat = _fused_convt_silu(
        xd, w_pad, b_col, cin=Cin, kh=KH, kw=KW, oh=OH, ow=OW)

    # Kernel output is already (N, C, spatial): only a reshape + tiny channel
    # slice, no NHWC->NCHW transpose (review item 6).
    v4 = v4_flat.reshape(N, Cout_pad, OH, OW)[:, :Cout]
    v3 = v3_flat.reshape(N, Cout_pad, OH, OW)[:, :Cout]
    return v4, v3


def _ref_conv_transpose(x, w, b, stride, pad):
    """Slow numpy reference for ConvTranspose2d (NCHW, weight (Cin,Cout,KH,KW))."""
    N, Cin, H, W = x.shape
    _, Cout, KH, KW = w.shape
    OH = (H - 1) * stride - 2 * pad + KH
    OW = (W - 1) * stride - 2 * pad + KW
    out = np.zeros((N, Cout, OH, OW), np.float32)
    for n in range(N):
        for ci in range(Cin):
            for ih in range(H):
                for iw in range(W):
                    for kh in range(KH):
                        for kw in range(KW):
                            oh = ih * stride - pad + kh
                            ow = iw * stride - pad + kw
                            if 0 <= oh < OH and 0 <= ow < OW:
                                out[n, :, oh, ow] += x[n, ci, ih, iw] * w[ci, :, kh, kw]
    return out + b[None, :, None, None]


if __name__ == "__main__":
    key = jax.random.PRNGKey(0)
    kx, kw1, kb1, kw2, kb2 = jax.random.split(key, 5)

    N, Cin, H, W = 2, 3, 2, 2
    K = 4

    x = jax.random.normal(kx, (N, Cin, H, W), dtype=jnp.float32)

    # Deterministic parameter init (uniform +-1/sqrt(fan), like PyTorch default).
    bound1 = 1.0 / np.sqrt(Cin * K * K)
    w1 = jax.random.uniform(kw1, (Cin, 8, K, K), jnp.float32, -bound1, bound1)
    b1 = jax.random.uniform(kb1, (8,), jnp.float32, -bound1, bound1)
    w2 = jax.random.uniform(kw2, (Cin, 6, K, K), jnp.float32, -bound1, bound1)
    b2 = jax.random.uniform(kb2, (6,), jnp.float32, -bound1, bound1)

    # Pre-round x to bf16-representable values so the bf16 dilated input seen by
    # the kernel matches the f32 numpy reference exactly (weights stay f32).
    x = x.astype(jnp.bfloat16).astype(jnp.float32)

    v4, v3 = model_forward(x, w1, b1, w2, b2)
    jax.block_until_ready((v4, v3))

    # Correctness check against a slow numpy reference.
    v2_ref = _ref_conv_transpose(np.asarray(x), np.asarray(w2), np.asarray(b2),
                                 stride=2, pad=1)
    v3_ref = 1.0 / (1.0 + np.exp(-v2_ref))
    v4_ref = v2_ref * v3_ref
    assert v3.shape == (N, 6, 4, 4) and v4.shape == (N, 6, 4, 4)
    np.testing.assert_allclose(np.asarray(v3), v3_ref, rtol=1e-2, atol=1e-2)
    np.testing.assert_allclose(np.asarray(v4), v4_ref, rtol=1e-2, atol=1e-2)

    print("KERNEL_OK")
</pallas_src>

<mosaic_0001>
module attributes {stable_mosaic.version = 11 : i64} {
  func.func @kernel(%arg0: i32, %arg1: memref<1x3x7x7xbf16, #tpu.memory_space<vmem>>, %arg2: memref<8x48xf32, #tpu.memory_space<vmem>>, %arg3: memref<8x1xf32, #tpu.memory_space<vmem>>, %arg4: memref<1x8x16xf32, #tpu.memory_space<vmem>>, %arg5: memref<1x8x16xf32, #tpu.memory_space<vmem>>, %arg6: memref<48x16xf32, #tpu.memory_space<vmem>>) attributes {dimension_semantics = [#tpu.dimension_semantics<parallel>], iteration_bounds = array<i64: 2>, scalar_prefetch = 0 : i64, scratch_operands = 1 : i64, tpu.core_type = #tpu.core_type<tc>, window_params = [{transform_indices = @transform_0, window_bounds = array<i64: 1, 3, 7, 7>}, {pipeline_mode = #tpu.pipeline_mode<synchronous>, transform_indices = @transform_1, window_bounds = array<i64: 8, 48>}, {pipeline_mode = #tpu.pipeline_mode<synchronous>, transform_indices = @transform_2, window_bounds = array<i64: 8, 1>}, {transform_indices = @transform_3, window_bounds = array<i64: 1, 8, 16>}, {transform_indices = @transform_4, window_bounds = array<i64: 1, 8, 16>}]} {
    %c0 = arith.constant 0 : index
    %c0_0 = arith.constant 0 : index
    %c0_1 = arith.constant 0 : index
    %c0_2 = arith.constant 0 : index
    %0 = vector.load %arg1[%c0, %c0_0, %c0_1, %c0_2] : memref<1x3x7x7xbf16, #tpu.memory_space<vmem>>, vector<1x3x1x4xbf16>
    %1 = vector.shape_cast %0 : vector<1x3x1x4xbf16> to vector<3x4xbf16>
    %2 = arith.extf %1 : vector<3x4xbf16> to vector<3x4xf32>
    %c0_3 = arith.constant 0 : index
    %c0_4 = arith.constant 0 : index
    %3 = vector.load %arg6[%c0_3, %c0_4] : memref<48x16xf32, #tpu.memory_space<vmem>>, vector<3x4xf32>
    tpu.vector_store %arg6[%c0_3, %c0_4], %2 {strides = array<i32>} : memref<48x16xf32, #tpu.memory_space<vmem>>, vector<3x4xf32>,
    %c0_5 = arith.constant 0 : index
    %c0_6 = arith.constant 0 : index
    %c1 = arith.constant 1 : index
    %c0_7 = arith.constant 0 : index
    %4 = vector.load %arg1[%c0_5, %c0_6, %c1, %c0_7] : memref<1x3x7x7xbf16, #tpu.memory_space<vmem>>, vector<1x3x1x4xbf16>
    %5 = vector.shape_cast %4 : vector<1x3x1x4xbf16> to vector<3x4xbf16>
    %6 = arith.extf %5 : vector<3x4xbf16> to vector<3x4xf32>
    %c0_8 = arith.constant 0 : index
    %c4 = arith.constant 4 : index
    %7 = vector.load %arg6[%c0_8, %c4] : memref<48x16xf32, #tpu.memory_space<vmem>>, vector<3x4xf32>
    tpu.vector_store %arg6[%c0_8, %c4], %6 {strides = array<i32>} : memref<48x16xf32, #tpu.memory_space<vmem>>, vector<3x4xf32>,
    %c0_9 = arith.constant 0 : index
    %c0_10 = arith.constant 0 : index
    %c2 = arith.constant 2 : index
    %c0_11 = arith.constant 0 : index
    %8 = vector.load %arg1[%c0_9, %c0_10, %c2, %c0_11] : memref<1x3x7x7xbf16, #tpu.memory_space<vmem>>, vector<1x3x1x4xbf16>
    %9 = vector.shape_cast %8 : vector<1x3x1x4xbf16> to vector<3x4xbf16>
    %10 = arith.extf %9 : vector<3x4xbf16> to vector<3x4xf32>
    %c0_12 = arith.constant 0 : index
    %c8 = arith.constant 8 : index
    %11 = vector.load %arg6[%c0_12, %c8] : memref<48x16xf32, #tpu.memory_space<vmem>>, vector<3x4xf32>
    tpu.vector_store %arg6[%c0_12, %c8], %10 {strides = array<i32>} : memref<48x16xf32, #tpu.memory_space<vmem>>, vector<3x4xf32>,
    %c0_13 = arith.constant 0 : index
    %c0_14 = arith.constant 0 : index
    %c3 = arith.constant 3 : index
    %c0_15 = arith.constant 0 : index
    %12 = vector.load %arg1[%c0_13, %c0_14, %c3, %c0_15] : memref<1x3x7x7xbf16, #tpu.memory_space<vmem>>, vector<1x3x1x4xbf16>
    %13 = vector.shape_cast %12 : vector<1x3x1x4xbf16> to vector<3x4xbf16>
    %14 = arith.extf %13 : vector<3x4xbf16> to vector<3x4xf32>
    %c0_16 = arith.constant 0 : index
    %c12 = arith.constant 12 : index
    %15 = vector.load %arg6[%c0_16, %c12] : memref<48x16xf32, #tpu.memory_space<vmem>>, vector<3x4xf32>
    tpu.vector_store %arg6[%c0_16, %c12], %14 {strides = array<i32>} : memref<48x16xf32, #tpu.memory_space<vmem>>, vector<3x4xf32>,
    %c0_17 = arith.constant 0 : index
    %c0_18 = arith.constant 0 : index
    %c0_19 = arith.constant 0 : index
    %c1_20 = arith.constant 1 : index
    %16 = vector.load %arg1[%c0_17, %c0_18, %c0_19, %c1_20] : memref<1x3x7x7xbf16, #tpu.memory_space<vmem>>, vector<1x3x1x4xbf16>
    %17 = vector.shape_cast %16 : vector<1x3x1x4xbf16> to vector<3x4xbf16>
    %18 = arith.extf %17 : vector<3x4xbf16> to vector<3x4xf32>
    %c3_21 = arith.constant 3 : index
    %c0_22 = arith.constant 0 : index
    %19 = vector.load %arg6[%c3_21, %c0_22] : memref<48x16xf32, #tpu.memory_space<vmem>>, vector<3x4xf32>
    tpu.vector_store %arg6[%c3_21, %c0_22], %18 {strides = array<i32>} : memref<48x16xf32, #tpu.memory_space<vmem>>, vector<3x4xf32>,
    %c0_23 = arith.constant 0 : index
    %c0_24 = arith.constant 0 : index
    %c1_25 = arith.constant 1 : index
    %c1_26 = arith.constant 1 : index
    %20 = vector.load %arg1[%c0_23, %c0_24, %c1_25, %c1_26] : memref<1x3x7x7xbf16, #tpu.memory_space<vmem>>, vector<1x3x1x4xbf16>
    %21 = vector.shape_cast %20 : vector<1x3x1x4xbf16> to vector<3x4xbf16>
    %22 = arith.extf %21 : vector<3x4xbf16> to vector<3x4xf32>
    %c3_27 = arith.constant 3 : index
    %c4_28 = arith.constant 4 : index
    %23 = vector.load %arg6[%c3_27, %c4_28] : memref<48x16xf32, #tpu.memory_space<vmem>>, vector<3x4xf32>
    tpu.vector_store %arg6[%c3_27, %c4_28], %22 {strides = array<i32>} : memref<48x16xf32, #tpu.memory_space<vmem>>, vector<3x4xf32>,
    %c0_29 = arith.constant 0 : index
    %c0_30 = arith.constant 0 : index
    %c2_31 = arith.constant 2 : index
    %c1_32 = arith.constant 1 : index
    %24 = vector.load %arg1[%c0_29, %c0_30, %c2_31, %c1_32] : memref<1x3x7x7xbf16, #tpu.memory_space<vmem>>, vector<1x3x1x4xbf16>
    %25 = vector.shape_cast %24 : vector<1x3x1x4xbf16> to vector<3x4xbf16>
    %26 = arith.extf %25 : vector<3x4xbf16> to vector<3x4xf32>
    %c3_33 = arith.constant 3 : index
    %c8_34 = arith.constant 8 : index
    %27 = vector.load %arg6[%c3_33, %c8_34] : memref<48x16xf32, #tpu.memory_space<vmem>>, vector<3x4xf32>
    tpu.vector_store %arg6[%c3_33, %c8_34], %26 {strides = array<i32>} : memref<48x16xf32, #tpu.memory_space<vmem>>, vector<3x4xf32>,
    %c0_35 = arith.constant 0 : index
    %c0_36 = arith.constant 0 : index
    %c3_37 = arith.constant 3 : index
    %c1_38 = arith.constant 1 : index
    %28 = vector.load %arg1[%c0_35, %c0_36, %c3_37, %c1_38] : memref<1x3x7x7xbf16, #tpu.memory_space<vmem>>, vector<1x3x1x4xbf16>
    %29 = vector.shape_cast %28 : vector<1x3x1x4xbf16> to vector<3x4xbf16>
    %30 = arith.extf %29 : vector<3x4xbf16> to vector<3x4xf32>
    %c3_39 = arith.constant 3 : index
    %c12_40 = arith.constant 12 : index
    %31 = vector.load %arg6[%c3_39, %c12_40] : memref<48x16xf32, #tpu.memory_space<vmem>>, vector<3x4xf32>
    tpu.vector_store %arg6[%c3_39, %c12_40], %30 {strides = array<i32>} : memref<48x16xf32, #tpu.memory_space<vmem>>, vector<3x4xf32>,
    %c0_41 = arith.constant 0 : index
    %c0_42 = arith.constant 0 : index
    %c0_43 = arith.constant 0 : index
    %c2_44 = arith.constant 2 : index
    %32 = vector.load %arg1[%c0_41, %c0_42, %c0_43, %c2_44] : memref<1x3x7x7xbf16, #tpu.memory_space<vmem>>, vector<1x3x1x4xbf16>
    %33 = vector.shape_cast %32 : vector<1x3x1x4xbf16> to vector<3x4xbf16>
    %34 = arith.extf %33 : vector<3x4xbf16> to vector<3x4xf32>
    %c6 = arith.constant 6 : index
    %c0_45 = arith.constant 0 : index
    %35 = vector.load %arg6[%c6, %c0_45] : memref<48x16xf32, #tpu.memory_space<vmem>>, vector<3x4xf32>
    tpu.vector_store %arg6[%c6, %c0_45], %34 {strides = array<i32>} : memref<48x16xf32, #tpu.memory_space<vmem>>, vector<3x4xf32>,
    %c0_46 = arith.constant 0 : index
    %c0_47 = arith.constant 0 : index
    %c1_48 = arith.constant 1 : index
    %c2_49 = arith.constant 2 : index
    %36 = vector.load %arg1[%c0_46, %c0_47, %c1_48, %c2_49] : memref<1x3x7x7xbf16, #tpu.memory_space<vmem>>, vector<1x3x1x4xbf16>
    %37 = vector.shape_cast %36 : vector<1x3x1x4xbf16> to vector<3x4xbf16>
    %38 = arith.extf %37 : vector<3x4xbf16> to vector<3x4xf32>
    %c6_50 = arith.constant 6 : index
    %c4_51 = arith.constant 4 : index
    %39 = vector.load %arg6[%c6_50, %c4_51] : memref<48x16xf32, #tpu.memory_space<vmem>>, vector<3x4xf32>
    tpu.vector_store %arg6[%c6_50, %c4_51], %38 {strides = array<i32>} : memref<48x16xf32, #tpu.memory_space<vmem>>, vector<3x4xf32>,
    %c0_52 = arith.constant 0 : index
    %c0_53 = arith.constant 0 : index
    %c2_54 = arith.constant 2 : index
    %c2_55 = arith.constant 2 : index
    %40 = vector.load %arg1[%c0_52, %c0_53, %c2_54, %c2_55] : memref<1x3x7x7xbf16, #tpu.memory_space<vmem>>, vector<1x3x1x4xbf16>
    %41 = vector.shape_cast %40 : vector<1x3x1x4xbf16> to vector<3x4xbf16>
    %42 = arith.extf %41 : vector<3x4xbf16> to vector<3x4xf32>
    %c6_56 = arith.constant 6 : index
    %c8_57 = arith.constant 8 : index
    %43 = vector.load %arg6[%c6_56, %c8_57] : memref<48x16xf32, #tpu.memory_space<vmem>>, vector<3x4xf32>
    tpu.vector_store %arg6[%c6_56, %c8_57], %42 {strides = array<i32>} : memref<48x16xf32, #tpu.memory_space<vmem>>, vector<3x4xf32>,
    %c0_58 = arith.constant 0 : index
    %c0_59 = arith.constant 0 : index
    %c3_60 = arith.constant 3 : index
    %c2_61 = arith.constant 2 : index
    %44 = vector.load %arg1[%c0_58, %c0_59, %c3_60, %c2_61] : memref<1x3x7x7xbf16, #tpu.memory_space<vmem>>, vector<1x3x1x4xbf16>
    %45 = vector.shape_cast %44 : vector<1x3x1x4xbf16> to vector<3x4xbf16>
    %46 = arith.extf %45 : vector<3x4xbf16> to vector<3x4xf32>
    %c6_62 = arith.constant 6 : index
    %c12_63 = arith.constant 12 : index
    %47 = vector.load %arg6[%c6_62, %c12_63] : memref<48x16xf32, #tpu.memory_space<vmem>>, vector<3x4xf32>
    tpu.vector_store %arg6[%c6_62, %c12_63], %46 {strides = array<i32>} : memref<48x16xf32, #tpu.memory_space<vmem>>, vector<3x4xf32>,
    %c0_64 = arith.constant 0 : index
    %c0_65 = arith.constant 0 : index
    %c0_66 = arith.constant 0 : index
    %c3_67 = arith.constant 3 : index
    %48 = vector.load %arg1[%c0_64, %c0_65, %c0_66, %c3_67] : memref<1x3x7x7xbf16, #tpu.memory_space<vmem>>, vector<1x3x1x4xbf16>
    %49 = vector.shape_cast %48 : vector<1x3x1x4xbf16> to vector<3x4xbf16>
    %50 = arith.extf %49 : vector<3x4xbf16> to vector<3x4xf32>
    %c9 = arith.constant 9 : index
    %c0_68 = arith.constant 0 : index
    %51 = vector.load %arg6[%c9, %c0_68] : memref<48x16xf32, #tpu.memory_space<vmem>>, vector<3x4xf32>
    tpu.vector_store %arg6[%c9, %c0_68], %50 {strides = array<i32>} : memref<48x16xf32, #tpu.memory_space<vmem>>, vector<3x4xf32>,
    %c0_69 = arith.constant 0 : index
    %c0_70 = arith.constant 0 : index
    %c1_71 = arith.constant 1 : index
    %c3_72 = arith.constant 3 : index
    %52 = vector.load %arg1[%c0_69, %c0_70, %c1_71, %c3_72] : memref<1x3x7x7xbf16, #tpu.memory_space<vmem>>, vector<1x3x1x4xbf16>
    %53 = vector.shape_cast %52 : vector<1x3x1x4xbf16> to vector<3x4xbf16>
    %54 = arith.extf %53 : vector<3x4xbf16> to vector<3x4xf32>
    %c9_73 = arith.constant 9 : index
    %c4_74 = arith.constant 4 : index
    %55 = vector.load %arg6[%c9_73, %c4_74] : memref<48x16xf32, #tpu.memory_space<vmem>>, vector<3x4xf32>
    tpu.vector_store %arg6[%c9_73, %c4_74], %54 {strides = array<i32>} : memref<48x16xf32, #tpu.memory_space<vmem>>, vector<3x4xf32>,
    %c0_75 = arith.constant 0 : index
    %c0_76 = arith.constant 0 : index
    %c2_77 = arith.constant 2 : index
    %c3_78 = arith.constant 3 : index
    %56 = vector.load %arg1[%c0_75, %c0_76, %c2_77, %c3_78] : memref<1x3x7x7xbf16, #tpu.memory_space<vmem>>, vector<1x3x1x4xbf16>
    %57 = vector.shape_cast %56 : vector<1x3x1x4xbf16> to vector<3x4xbf16>
    %58 = arith.extf %57 : vector<3x4xbf16> to vector<3x4xf32>
    %c9_79 = arith.constant 9 : index
    %c8_80 = arith.constant 8 : index
    %59 = vector.load %arg6[%c9_79, %c8_80] : memref<48x16xf32, #tpu.memory_space<vmem>>, vector<3x4xf32>
    tpu.vector_store %arg6[%c9_79, %c8_80], %58 {strides = array<i32>} : memref<48x16xf32, #tpu.memory_space<vmem>>, vector<3x4xf32>,
    %c0_81 = arith.constant 0 : index
    %c0_82 = arith.constant 0 : index
    %c3_83 = arith.constant 3 : index
    %c3_84 = arith.constant 3 : index
    %60 = vector.load %arg1[%c0_81, %c0_82, %c3_83, %c3_84] : memref<1x3x7x7xbf16, #tpu.memory_space<vmem>>, vector<1x3x1x4xbf16>
    %61 = vector.shape_cast %60 : vector<1x3x1x4xbf16> to vector<3x4xbf16>
    %62 = arith.extf %61 : vector<3x4xbf16> to vector<3x4xf32>
    %c9_85 = arith.constant 9 : index
    %c12_86 = arith.constant 12 : index
    %63 = vector.load %arg6[%c9_85, %c12_86] : memref<48x16xf32, #tpu.memory_space<vmem>>, vector<3x4xf32>
    tpu.vector_store %arg6[%c9_85, %c12_86], %62 {strides = array<i32>} : memref<48x16xf32, #tpu.memory_space<vmem>>, vector<3x4xf32>,
    %c0_87 = arith.constant 0 : index
    %c0_88 = arith.constant 0 : index
    %c1_89 = arith.constant 1 : index
    %c0_90 = arith.constant 0 : index
    %64 = vector.load %arg1[%c0_87, %c0_88, %c1_89, %c0_90] : memref<1x3x7x7xbf16, #tpu.memory_space<vmem>>, vector<1x3x1x4xbf16>
    %65 = vector.shape_cast %64 : vector<1x3x1x4xbf16> to vector<3x4xbf16>
    %66 = arith.extf %65 : vector<3x4xbf16> to vector<3x4xf32>
    %c12_91 = arith.constant 12 : index
    %c0_92 = arith.constant 0 : index
    %67 = vector.load %arg6[%c12_91, %c0_92] : memref<48x16xf32, #tpu.memory_space<vmem>>, vector<3x4xf32>
    tpu.vector_store %arg6[%c12_91, %c0_92], %66 {strides = array<i32>} : memref<48x16xf32, #tpu.memory_space<vmem>>, vector<3x4xf32>,
    %c0_93 = arith.constant 0 : index
    %c0_94 = arith.constant 0 : index
    %c2_95 = arith.constant 2 : index
    %c0_96 = arith.constant 0 : index
    %68 = vector.load %arg1[%c0_93, %c0_94, %c2_95, %c0_96] : memref<1x3x7x7xbf16, #tpu.memory_space<vmem>>, vector<1x3x1x4xbf16>
    %69 = vector.shape_cast %68 : vector<1x3x1x4xbf16> to vector<3x4xbf16>
    %70 = arith.extf %69 : vector<3x4xbf16> to vector<3x4xf32>
    %c12_97 = arith.constant 12 : index
    %c4_98 = arith.constant 4 : index
    %71 = vector.load %arg6[%c12_97, %c4_98] : memref<48x16xf32, #tpu.memory_space<vmem>>, vector<3x4xf32>
    tpu.vector_store %arg6[%c12_97, %c4_98], %70 {strides = array<i32>} : memref<48x16xf32, #tpu.memory_space<vmem>>, vector<3x4xf32>,
    %c0_99 = arith.constant 0 : index
    %c0_100 = arith.constant 0 : index
    %c3_101 = arith.constant 3 : index
    %c0_102 = arith.constant 0 : index
    %72 = vector.load %arg1[%c0_99, %c0_100, %c3_101, %c0_102] : memref<1x3x7x7xbf16, #tpu.memory_space<vmem>>, vector<1x3x1x4xbf16>
    %73 = vector.shape_cast %72 : vector<1x3x1x4xbf16> to vector<3x4xbf16>
    %74 = arith.extf %73 : vector<3x4xbf16> to vector<3x4xf32>
    %c12_103 = arith.constant 12 : index
    %c8_104 = arith.constant 8 : index
    %75 = vector.load %arg6[%c12_103, %c8_104] : memref<48x16xf32, #tpu.memory_space<vmem>>, vector<3x4xf32>
    tpu.vector_store %arg6[%c12_103, %c8_104], %74 {strides = array<i32>} : memref<48x16xf32, #tpu.memory_space<vmem>>, vector<3x4xf32>,
    %c0_105 = arith.constant 0 : index
    %c0_106 = arith.constant 0 : index
    %c4_107 = arith.constant 4 : index
    %c0_108 = arith.constant 0 : index
    %76 = vector.load %arg1[%c0_105, %c0_106, %c4_107, %c0_108] : memref<1x3x7x7xbf16, #tpu.memory_space<vmem>>, vector<1x3x1x4xbf16>
    %77 = vector.shape_cast %76 : vector<1x3x1x4xbf16> to vector<3x4xbf16>
    %78 = arith.extf %77 : vector<3x4xbf16> to vector<3x4xf32>
    %c12_109 = arith.constant 12 : index
    %c12_110 = arith.constant 12 : index
    %79 = vector.load %arg6[%c12_109, %c12_110] : memref<48x16xf32, #tpu.memory_space<vmem>>, vector<3x4xf32>
    tpu.vector_store %arg6[%c12_109, %c12_110], %78 {strides = array<i32>} : memref<48x16xf32, #tpu.memory_space<vmem>>, vector<3x4xf32>,
    %c0_111 = arith.constant 0 : index
    %c0_112 = arith.constant 0 : index
    %c1_113 = arith.constant 1 : index
    %c1_114 = arith.constant 1 : index
    %80 = vector.load %arg1[%c0_111, %c0_112, %c1_113, %c1_114] : memref<1x3x7x7xbf16, #tpu.memory_space<vmem>>, vector<1x3x1x4xbf16>
    %81 = vector.shape_cast %80 : vector<1x3x1x4xbf16> to vector<3x4xbf16>
    %82 = arith.extf %81 : vector<3x4xbf16> to vector<3x4xf32>
    %c15 = arith.constant 15 : index
    %c0_115 = arith.constant 0 : index
    %83 = vector.load %arg6[%c15, %c0_115] : memref<48x16xf32, #tpu.memory_space<vmem>>, vector<3x4xf32>
    tpu.vector_store %arg6[%c15, %c0_115], %82 {strides = array<i32>} : memref<48x16xf32, #tpu.memory_space<vmem>>, vector<3x4xf32>,
    %c0_116 = arith.constant 0 : index
    %c0_117 = arith.constant 0 : index
    %c2_118 = arith.constant 2 : index
    %c1_119 = arith.constant 1 : index
    %84 = vector.load %arg1[%c0_116, %c0_117, %c2_118, %c1_119] : memref<1x3x7x7xbf16, #tpu.memory_space<vmem>>, vector<1x3x1x4xbf16>
    %85 = vector.shape_cast %84 : vector<1x3x1x4xbf16> to vector<3x4xbf16>
    %86 = arith.extf %85 : vector<3x4xbf16> to vector<3x4xf32>
    %c15_120 = arith.constant 15 : index
    %c4_121 = arith.constant 4 : index
    %87 = vector.load %arg6[%c15_120, %c4_121] : memref<48x16xf32, #tpu.memory_space<vmem>>, vector<3x4xf32>
    tpu.vector_store %arg6[%c15_120, %c4_121], %86 {strides = array<i32>} : memref<48x16xf32, #tpu.memory_space<vmem>>, vector<3x4xf32>,
    %c0_122 = arith.constant 0 : index
    %c0_123 = arith.constant 0 : index
    %c3_124 = arith.constant 3 : index
    %c1_125 = arith.constant 1 : index
    %88 = vector.load %arg1[%c0_122, %c0_123, %c3_124, %c1_125] : memref<1x3x7x7xbf16, #tpu.memory_space<vmem>>, vector<1x3x1x4xbf16>
    %89 = vector.shape_cast %88 : vector<1x3x1x4xbf16> to vector<3x4xbf16>
    %90 = arith.extf %89 : vector<3x4xbf16> to vector<3x4xf32>
    %c15_126 = arith.constant 15 : index
    %c8_127 = arith.constant 8 : index
    %91 = vector.load %arg6[%c15_126, %c8_127] : memref<48x16xf32, #tpu.memory_space<vmem>>, vector<3x4xf32>
    tpu.vector_store %arg6[%c15_126, %c8_127], %90 {strides = array<i32>} : memref<48x16xf32, #tpu.memory_space<vmem>>, vector<3x4xf32>,
    %c0_128 = arith.constant 0 : index
    %c0_129 = arith.constant 0 : index
    %c4_130 = arith.constant 4 : index
    %c1_131 = arith.constant 1 : index
    %92 = vector.load %arg1[%c0_128, %c0_129, %c4_130, %c1_131] : memref<1x3x7x7xbf16, #tpu.memory_space<vmem>>, vector<1x3x1x4xbf16>
    %93 = vector.shape_cast %92 : vector<1x3x1x4xbf16> to vector<3x4xbf16>
    %94 = arith.extf %93 : vector<3x4xbf16> to vector<3x4xf32>
    %c15_132 = arith.constant 15 : index
    %c12_133 = arith.constant 12 : index
    %95 = vector.load %arg6[%c15_132, %c12_133] : memref<48x16xf32, #tpu.memory_space<vmem>>, vector<3x4xf32>
    tpu.vector_store %arg6[%c15_132, %c12_133], %94 {strides = array<i32>} : memref<48x16xf32, #tpu.memory_space<vmem>>, vector<3x4xf32>,
    %c0_134 = arith.constant 0 : index
    %c0_135 = arith.constant 0 : index
    %c1_136 = arith.constant 1 : index
    %c2_137 = arith.constant 2 : index
    %96 = vector.load %arg1[%c0_134, %c0_135, %c1_136, %c2_137] : memref<1x3x7x7xbf16, #tpu.memory_space<vmem>>, vector<1x3x1x4xbf16>
    %97 = vector.shape_cast %96 : vector<1x3x1x4xbf16> to vector<3x4xbf16>
    %98 = arith.extf %97 : vector<3x4xbf16> to vector<3x4xf32>
    %c18 = arith.constant 18 : index
    %c0_138 = arith.constant 0 : index
    %99 = vector.load %arg6[%c18, %c0_138] : memref<48x16xf32, #tpu.memory_space<vmem>>, vector<3x4xf32>
    tpu.vector_store %arg6[%c18, %c0_138], %98 {strides = array<i32>} : memref<48x16xf32, #tpu.memory_space<vmem>>, vector<3x4xf32>,
    %c0_139 = arith.constant 0 : index
    %c0_140 = arith.constant 0 : index
    %c2_141 = arith.constant 2 : index
    %c2_142 = arith.constant 2 : index
    %100 = vector.load %arg1[%c0_139, %c0_140, %c2_141, %c2_142] : memref<1x3x7x7xbf16, #tpu.memory_space<vmem>>, vector<1x3x1x4xbf16>
    %101 = vector.shape_cast %100 : vector<1x3x1x4xbf16> to vector<3x4xbf16>
    %102 = arith.extf %101 : vector<3x4xbf16> to vector<3x4xf32>
    %c18_143 = arith.constant 18 : index
    %c4_144 = arith.constant 4 : index
    %103 = vector.load %arg6[%c18_143, %c4_144] : memref<48x16xf32, #tpu.memory_space<vmem>>, vector<3x4xf32>
    tpu.vector_store %arg6[%c18_143, %c4_144], %102 {strides = array<i32>} : memref<48x16xf32, #tpu.memory_space<vmem>>, vector<3x4xf32>,
    %c0_145 = arith.constant 0 : index
    %c0_146 = arith.constant 0 : index
    %c3_147 = arith.constant 3 : index
    %c2_148 = arith.constant 2 : index
    %104 = vector.load %arg1[%c0_145, %c0_146, %c3_147, %c2_148] : memref<1x3x7x7xbf16, #tpu.memory_space<vmem>>, vector<1x3x1x4xbf16>
    %105 = vector.shape_cast %104 : vector<1x3x1x4xbf16> to vector<3x4xbf16>
    %106 = arith.extf %105 : vector<3x4xbf16> to vector<3x4xf32>
    %c18_149 = arith.constant 18 : index
    %c8_150 = arith.constant 8 : index
    %107 = vector.load %arg6[%c18_149, %c8_150] : memref<48x16xf32, #tpu.memory_space<vmem>>, vector<3x4xf32>
    tpu.vector_store %arg6[%c18_149, %c8_150], %106 {strides = array<i32>} : memref<48x16xf32, #tpu.memory_space<vmem>>, vector<3x4xf32>,
    %c0_151 = arith.constant 0 : index
    %c0_152 = arith.constant 0 : index
    %c4_153 = arith.constant 4 : index
    %c2_154 = arith.constant 2 : index
    %108 = vector.load %arg1[%c0_151, %c0_152, %c4_153, %c2_154] : memref<1x3x7x7xbf16, #tpu.memory_space<vmem>>, vector<1x3x1x4xbf16>
    %109 = vector.shape_cast %108 : vector<1x3x1x4xbf16> to vector<3x4xbf16>
    %110 = arith.extf %109 : vector<3x4xbf16> to vector<3x4xf32>
    %c18_155 = arith.constant 18 : index
    %c12_156 = arith.constant 12 : index
    %111 = vector.load %arg6[%c18_155, %c12_156] : memref<48x16xf32, #tpu.memory_space<vmem>>, vector<3x4xf32>
    tpu.vector_store %arg6[%c18_155, %c12_156], %110 {strides = array<i32>} : memref<48x16xf32, #tpu.memory_space<vmem>>, vector<3x4xf32>,
    %c0_157 = arith.constant 0 : index
    %c0_158 = arith.constant 0 : index
    %c1_159 = arith.constant 1 : index
    %c3_160 = arith.constant 3 : index
    %112 = vector.load %arg1[%c0_157, %c0_158, %c1_159, %c3_160] : memref<1x3x7x7xbf16, #tpu.memory_space<vmem>>, vector<1x3x1x4xbf16>
    %113 = vector.shape_cast %112 : vector<1x3x1x4xbf16> to vector<3x4xbf16>
    %114 = arith.extf %113 : vector<3x4xbf16> to vector<3x4xf32>
    %c21 = arith.constant 21 : index
    %c0_161 = arith.constant 0 : index
    %115 = vector.load %arg6[%c21, %c0_161] : memref<48x16xf32, #tpu.memory_space<vmem>>, vector<3x4xf32>
    tpu.vector_store %arg6[%c21, %c0_161], %114 {strides = array<i32>} : memref<48x16xf32, #tpu.memory_space<vmem>>, vector<3x4xf32>,
    %c0_162 = arith.constant 0 : index
    %c0_163 = arith.constant 0 : index
    %c2_164 = arith.constant 2 : index
    %c3_165 = arith.constant 3 : index
    %116 = vector.load %arg1[%c0_162, %c0_163, %c2_164, %c3_165] : memref<1x3x7x7xbf16, #tpu.memory_space<vmem>>, vector<1x3x1x4xbf16>
    %117 = vector.shape_cast %116 : vector<1x3x1x4xbf16> to vector<3x4xbf16>
    %118 = arith.extf %117 : vector<3x4xbf16> to vector<3x4xf32>
    %c21_166 = arith.constant 21 : index
    %c4_167 = arith.constant 4 : index
    %119 = vector.load %arg6[%c21_166, %c4_167] : memref<48x16xf32, #tpu.memory_space<vmem>>, vector<3x4xf32>
    tpu.vector_store %arg6[%c21_166, %c4_167], %118 {strides = array<i32>} : memref<48x16xf32, #tpu.memory_space<vmem>>, vector<3x4xf32>,
    %c0_168 = arith.constant 0 : index
    %c0_169 = arith.constant 0 : index
    %c3_170 = arith.constant 3 : index
    %c3_171 = arith.constant 3 : index
    %120 = vector.load %arg1[%c0_168, %c0_169, %c3_170, %c3_171] : memref<1x3x7x7xbf16, #tpu.memory_space<vmem>>, vector<1x3x1x4xbf16>
    %121 = vector.shape_cast %120 : vector<1x3x1x4xbf16> to vector<3x4xbf16>
    %122 = arith.extf %121 : vector<3x4xbf16> to vector<3x4xf32>
    %c21_172 = arith.constant 21 : index
    %c8_173 = arith.constant 8 : index
    %123 = vector.load %arg6[%c21_172, %c8_173] : memref<48x16xf32, #tpu.memory_space<vmem>>, vector<3x4xf32>
    tpu.vector_store %arg6[%c21_172, %c8_173], %122 {strides = array<i32>} : memref<48x16xf32, #tpu.memory_space<vmem>>, vector<3x4xf32>,
    %c0_174 = arith.constant 0 : index
    %c0_175 = arith.constant 0 : index
    %c4_176 = arith.constant 4 : index
    %c3_177 = arith.constant 3 : index
    %124 = vector.load %arg1[%c0_174, %c0_175, %c4_176, %c3_177] : memref<1x3x7x7xbf16, #tpu.memory_space<vmem>>, vector<1x3x1x4xbf16>
    %125 = vector.shape_cast %124 : vector<1x3x1x4xbf16> to vector<3x4xbf16>
    %126 = arith.extf %125 : vector<3x4xbf16> to vector<3x4xf32>
    %c21_178 = arith.constant 21 : index
    %c12_179 = arith.constant 12 : index
    %127 = vector.load %arg6[%c21_178, %c12_179] : memref<48x16xf32, #tpu.memory_space<vmem>>, vector<3x4xf32>
    tpu.vector_store %arg6[%c21_178, %c12_179], %126 {strides = array<i32>} : memref<48x16xf32, #tpu.memory_space<vmem>>, vector<3x4xf32>,
    %c0_180 = arith.constant 0 : index
    %c0_181 = arith.constant 0 : index
    %c2_182 = arith.constant 2 : index
    %c0_183 = arith.constant 0 : index
    %128 = vector.load %arg1[%c0_180, %c0_181, %c2_182, %c0_183] : memref<1x3x7x7xbf16, #tpu.memory_space<vmem>>, vector<1x3x1x4xbf16>
    %129 = vector.shape_cast %128 : vector<1x3x1x4xbf16> to vector<3x4xbf16>
    %130 = arith.extf %129 : vector<3x4xbf16> to vector<3x4xf32>
    %c24 = arith.constant 24 : index
    %c0_184 = arith.constant 0 : index
    %131 = vector.load %arg6[%c24, %c0_184] : memref<48x16xf32, #tpu.memory_space<vmem>>, vector<3x4xf32>
    tpu.vector_store %arg6[%c24, %c0_184], %130 {strides = array<i32>} : memref<48x16xf32, #tpu.memory_space<vmem>>, vector<3x4xf32>,
    %c0_185 = arith.constant 0 : index
    %c0_186 = arith.constant 0 : index
    %c3_187 = arith.constant 3 : index
    %c0_188 = arith.constant 0 : index
    %132 = vector.load %arg1[%c0_185, %c0_186, %c3_187, %c0_188] : memref<1x3x7x7xbf16, #tpu.memory_space<vmem>>, vector<1x3x1x4xbf16>
    %133 = vector.shape_cast %132 : vector<1x3x1x4xbf16> to vector<3x4xbf16>
    %134 = arith.extf %133 : vector<3x4xbf16> to vector<3x4xf32>
    %c24_189 = arith.constant 24 : index
    %c4_190 = arith.constant 4 : index
    %135 = vector.load %arg6[%c24_189, %c4_190] : memref<48x16xf32, #tpu.memory_space<vmem>>, vector<3x4xf32>
    tpu.vector_store %arg6[%c24_189, %c4_190], %134 {strides = array<i32>} : memref<48x16xf32, #tpu.memory_space<vmem>>, vector<3x4xf32>,
    %c0_191 = arith.constant 0 : index
    %c0_192 = arith.constant 0 : index
    %c4_193 = arith.constant 4 : index
    %c0_194 = arith.constant 0 : index
    %136 = vector.load %arg1[%c0_191, %c0_192, %c4_193, %c0_194] : memref<1x3x7x7xbf16, #tpu.memory_space<vmem>>, vector<1x3x1x4xbf16>
    %137 = vector.shape_cast %136 : vector<1x3x1x4xbf16> to vector<3x4xbf16>
    %138 = arith.extf %137 : vector<3x4xbf16> to vector<3x4xf32>
    %c24_195 = arith.constant 24 : index
    %c8_196 = arith.constant 8 : index
    %139 = vector.load %arg6[%c24_195, %c8_196] : memref<48x16xf32, #tpu.memory_space<vmem>>, vector<3x4xf32>
    tpu.vector_store %arg6[%c24_195, %c8_196], %138 {strides = array<i32>} : memref<48x16xf32, #tpu.memory_space<vmem>>, vector<3x4xf32>,
    %c0_197 = arith.constant 0 : index
    %c0_198 = arith.constant 0 : index
    %c5 = arith.constant 5 : index
    %c0_199 = arith.constant 0 : index
    %140 = vector.load %arg1[%c0_197, %c0_198, %c5, %c0_199] : memref<1x3x7x7xbf16, #tpu.memory_space<vmem>>, vector<1x3x1x4xbf16>
    %141 = vector.shape_cast %140 : vector<1x3x1x4xbf16> to vector<3x4xbf16>
    %142 = arith.extf %141 : vector<3x4xbf16> to vector<3x4xf32>
    %c24_200 = arith.constant 24 : index
    %c12_201 = arith.constant 12 : index
    %143 = vector.load %arg6[%c24_200, %c12_201] : memref<48x16xf32, #tpu.memory_space<vmem>>, vector<3x4xf32>
    tpu.vector_store %arg6[%c24_200, %c12_201], %142 {strides = array<i32>} : memref<48x16xf32, #tpu.memory_space<vmem>>, vector<3x4xf32>,
    %c0_202 = arith.constant 0 : index
    %c0_203 = arith.constant 0 : index
    %c2_204 = arith.constant 2 : index
    %c1_205 = arith.constant 1 : index
    %144 = vector.load %arg1[%c0_202, %c0_203, %c2_204, %c1_205] : memref<1x3x7x7xbf16, #tpu.memory_space<vmem>>, vector<1x3x1x4xbf16>
    %145 = vector.shape_cast %144 : vector<1x3x1x4xbf16> to vector<3x4xbf16>
    %146 = arith.extf %145 : vector<3x4xbf16> to vector<3x4xf32>
    %c27 = arith.constant 27 : index
    %c0_206 = arith.constant 0 : index
    %147 = vector.load %arg6[%c27, %c0_206] : memref<48x16xf32, #tpu.memory_space<vmem>>, vector<3x4xf32>
    tpu.vector_store %arg6[%c27, %c0_206], %146 {strides = array<i32>} : memref<48x16xf32, #tpu.memory_space<vmem>>, vector<3x4xf32>,
    %c0_207 = arith.constant 0 : index
    %c0_208 = arith.constant 0 : index
    %c3_209 = arith.constant 3 : index
    %c1_210 = arith.constant 1 : index
    %148 = vector.load %arg1[%c0_207, %c0_208, %c3_209, %c1_210] : memref<1x3x7x7xbf16, #tpu.memory_space<vmem>>, vector<1x3x1x4xbf16>
    %149 = vector.shape_cast %148 : vector<1x3x1x4xbf16> to vector<3x4xbf16>
    %150 = arith.extf %149 : vector<3x4xbf16> to vector<3x4xf32>
    %c27_211 = arith.constant 27 : index
    %c4_212 = arith.constant 4 : index
    %151 = vector.load %arg6[%c27_211, %c4_212] : memref<48x16xf32, #tpu.memory_space<vmem>>, vector<3x4xf32>
    tpu.vector_store %arg6[%c27_211, %c4_212], %150 {strides = array<i32>} : memref<48x16xf32, #tpu.memory_space<vmem>>, vector<3x4xf32>,
    %c0_213 = arith.constant 0 : index
    %c0_214 = arith.constant 0 : index
    %c4_215 = arith.constant 4 : index
    %c1_216 = arith.constant 1 : index
    %152 = vector.load %arg1[%c0_213, %c0_214, %c4_215, %c1_216] : memref<1x3x7x7xbf16, #tpu.memory_space<vmem>>, vector<1x3x1x4xbf16>
    %153 = vector.shape_cast %152 : vector<1x3x1x4xbf16> to vector<3x4xbf16>
    %154 = arith.extf %153 : vector<3x4xbf16> to vector<3x4xf32>
    %c27_217 = arith.constant 27 : index
    %c8_218 = arith.constant 8 : index
    %155 = vector.load %arg6[%c27_217, %c8_218] : memref<48x16xf32, #tpu.memory_space<vmem>>, vector<3x4xf32>
    tpu.vector_store %arg6[%c27_217, %c8_218], %154 {strides = array<i32>} : memref<48x16xf32, #tpu.memory_space<vmem>>, vector<3x4xf32>,
    %c0_219 = arith.constant 0 : index
    %c0_220 = arith.constant 0 : index
    %c5_221 = arith.constant 5 : index
    %c1_222 = arith.constant 1 : index
    %156 = vector.load %arg1[%c0_219, %c0_220, %c5_221, %c1_222] : memref<1x3x7x7xbf16, #tpu.memory_space<vmem>>, vector<1x3x1x4xbf16>
    %157 = vector.shape_cast %156 : vector<1x3x1x4xbf16> to vector<3x4xbf16>
    %158 = arith.extf %157 : vector<3x4xbf16> to vector<3x4xf32>
    %c27_223 = arith.constant 27 : index
    %c12_224 = arith.constant 12 : index
    %159 = vector.load %arg6[%c27_223, %c12_224] : memref<48x16xf32, #tpu.memory_space<vmem>>, vector<3x4xf32>
    tpu.vector_store %arg6[%c27_223, %c12_224], %158 {strides = array<i32>} : memref<48x16xf32, #tpu.memory_space<vmem>>, vector<3x4xf32>,
    %c0_225 = arith.constant 0 : index
    %c0_226 = arith.constant 0 : index
    %c2_227 = arith.constant 2 : index
    %c2_228 = arith.constant 2 : index
    %160 = vector.load %arg1[%c0_225, %c0_226, %c2_227, %c2_228] : memref<1x3x7x7xbf16, #tpu.memory_space<vmem>>, vector<1x3x1x4xbf16>
    %161 = vector.shape_cast %160 : vector<1x3x1x4xbf16> to vector<3x4xbf16>
    %162 = arith.extf %161 : vector<3x4xbf16> to vector<3x4xf32>
    %c30 = arith.constant 30 : index
    %c0_229 = arith.constant 0 : index
    %163 = vector.load %arg6[%c30, %c0_229] : memref<48x16xf32, #tpu.memory_space<vmem>>, vector<3x4xf32>
    tpu.vector_store %arg6[%c30, %c0_229], %162 {strides = array<i32>} : memref<48x16xf32, #tpu.memory_space<vmem>>, vector<3x4xf32>,
    %c0_230 = arith.constant 0 : index
    %c0_231 = arith.constant 0 : index
    %c3_232 = arith.constant 3 : index
    %c2_233 = arith.constant 2 : index
    %164 = vector.load %arg1[%c0_230, %c0_231, %c3_232, %c2_233] : memref<1x3x7x7xbf16, #tpu.memory_space<vmem>>, vector<1x3x1x4xbf16>
    %165 = vector.shape_cast %164 : vector<1x3x1x4xbf16> to vector<3x4xbf16>
    %166 = arith.extf %165 : vector<3x4xbf16> to vector<3x4xf32>
    %c30_234 = arith.constant 30 : index
    %c4_235 = arith.constant 4 : index
    %167 = vector.load %arg6[%c30_234, %c4_235] : memref<48x16xf32, #tpu.memory_space<vmem>>, vector<3x4xf32>
    tpu.vector_store %arg6[%c30_234, %c4_235], %166 {strides = array<i32>} : memref<48x16xf32, #tpu.memory_space<vmem>>, vector<3x4xf32>,
    %c0_236 = arith.constant 0 : index
    %c0_237 = arith.constant 0 : index
    %c4_238 = arith.constant 4 : index
    %c2_239 = arith.constant 2 : index
    %168 = vector.load %arg1[%c0_236, %c0_237, %c4_238, %c2_239] : memref<1x3x7x7xbf16, #tpu.memory_space<vmem>>, vector<1x3x1x4xbf16>
    %169 = vector.shape_cast %168 : vector<1x3x1x4xbf16> to vector<3x4xbf16>
    %170 = arith.extf %169 : vector<3x4xbf16> to vector<3x4xf32>
    %c30_240 = arith.constant 30 : index
    %c8_241 = arith.constant 8 : index
    %171 = vector.load %arg6[%c30_240, %c8_241] : memref<48x16xf32, #tpu.memory_space<vmem>>, vector<3x4xf32>
    tpu.vector_store %arg6[%c30_240, %c8_241], %170 {strides = array<i32>} : memref<48x16xf32, #tpu.memory_space<vmem>>, vector<3x4xf32>,
    %c0_242 = arith.constant 0 : index
    %c0_243 = arith.constant 0 : index
    %c5_244 = arith.constant 5 : index
    %c2_245 = arith.constant 2 : index
    %172 = vector.load %arg1[%c0_242, %c0_243, %c5_244, %c2_245] : memref<1x3x7x7xbf16, #tpu.memory_space<vmem>>, vector<1x3x1x4xbf16>
    %173 = vector.shape_cast %172 : vector<1x3x1x4xbf16> to vector<3x4xbf16>
    %174 = arith.extf %173 : vector<3x4xbf16> to vector<3x4xf32>
    %c30_246 = arith.constant 30 : index
    %c12_247 = arith.constant 12 : index
    %175 = vector.load %arg6[%c30_246, %c12_247] : memref<48x16xf32, #tpu.memory_space<vmem>>, vector<3x4xf32>
    tpu.vector_store %arg6[%c30_246, %c12_247], %174 {strides = array<i32>} : memref<48x16xf32, #tpu.memory_space<vmem>>, vector<3x4xf32>,
    %c0_248 = arith.constant 0 : index
    %c0_249 = arith.constant 0 : index
    %c2_250 = arith.constant 2 : index
    %c3_251 = arith.constant 3 : index
    %176 = vector.load %arg1[%c0_248, %c0_249, %c2_250, %c3_251] : memref<1x3x7x7xbf16, #tpu.memory_space<vmem>>, vector<1x3x1x4xbf16>
    %177 = vector.shape_cast %176 : vector<1x3x1x4xbf16> to vector<3x4xbf16>
    %178 = arith.extf %177 : vector<3x4xbf16> to vector<3x4xf32>
    %c33 = arith.constant 33 : index
    %c0_252 = arith.constant 0 : index
    %179 = vector.load %arg6[%c33, %c0_252] : memref<48x16xf32, #tpu.memory_space<vmem>>, vector<3x4xf32>
    tpu.vector_store %arg6[%c33, %c0_252], %178 {strides = array<i32>} : memref<48x16xf32, #tpu.memory_space<vmem>>, vector<3x4xf32>,
    %c0_253 = arith.constant 0 : index
    %c0_254 = arith.constant 0 : index
    %c3_255 = arith.constant 3 : index
    %c3_256 = arith.constant 3 : index
    %180 = vector.load %arg1[%c0_253, %c0_254, %c3_255, %c3_256] : memref<1x3x7x7xbf16, #tpu.memory_space<vmem>>, vector<1x3x1x4xbf16>
    %181 = vector.shape_cast %180 : vector<1x3x1x4xbf16> to vector<3x4xbf16>
    %182 = arith.extf %181 : vector<3x4xbf16> to vector<3x4xf32>
    %c33_257 = arith.constant 33 : index
    %c4_258 = arith.constant 4 : index
    %183 = vector.load %arg6[%c33_257, %c4_258] : memref<48x16xf32, #tpu.memory_space<vmem>>, vector<3x4xf32>
    tpu.vector_store %arg6[%c33_257, %c4_258], %182 {strides = array<i32>} : memref<48x16xf32, #tpu.memory_space<vmem>>, vector<3x4xf32>,
    %c0_259 = arith.constant 0 : index
    %c0_260 = arith.constant 0 : index
    %c4_261 = arith.constant 4 : index
    %c3_262 = arith.constant 3 : index
    %184 = vector.load %arg1[%c0_259, %c0_260, %c4_261, %c3_262] : memref<1x3x7x7xbf16, #tpu.memory_space<vmem>>, vector<1x3x1x4xbf16>
    %185 = vector.shape_cast %184 : vector<1x3x1x4xbf16> to vector<3x4xbf16>
    %186 = arith.extf %185 : vector<3x4xbf16> to vector<3x4xf32>
    %c33_263 = arith.constant 33 : index
    %c8_264 = arith.constant 8 : index
    %187 = vector.load %arg6[%c33_263, %c8_264] : memref<48x16xf32, #tpu.memory_space<vmem>>, vector<3x4xf32>
    tpu.vector_store %arg6[%c33_263, %c8_264], %186 {strides = array<i32>} : memref<48x16xf32, #tpu.memory_space<vmem>>, vector<3x4xf32>,
    %c0_265 = arith.constant 0 : index
    %c0_266 = arith.constant 0 : index
    %c5_267 = arith.constant 5 : index
    %c3_268 = arith.constant 3 : index
    %188 = vector.load %arg1[%c0_265, %c0_266, %c5_267, %c3_268] : memref<1x3x7x7xbf16, #tpu.memory_space<vmem>>, vector<1x3x1x4xbf16>
    %189 = vector.shape_cast %188 : vector<1x3x1x4xbf16> to vector<3x4xbf16>
    %190 = arith.extf %189 : vector<3x4xbf16> to vector<3x4xf32>
    %c33_269 = arith.constant 33 : index
    %c12_270 = arith.constant 12 : index
    %191 = vector.load %arg6[%c33_269, %c12_270] : memref<48x16xf32, #tpu.memory_space<vmem>>, vector<3x4xf32>
    tpu.vector_store %arg6[%c33_269, %c12_270], %190 {strides = array<i32>} : memref<48x16xf32, #tpu.memory_space<vmem>>, vector<3x4xf32>,
    %c0_271 = arith.constant 0 : index
    %c0_272 = arith.constant 0 : index
    %c3_273 = arith.constant 3 : index
    %c0_274 = arith.constant 0 : index
    %192 = vector.load %arg1[%c0_271, %c0_272, %c3_273, %c0_274] : memref<1x3x7x7xbf16, #tpu.memory_space<vmem>>, vector<1x3x1x4xbf16>
    %193 = vector.shape_cast %192 : vector<1x3x1x4xbf16> to vector<3x4xbf16>
    %194 = arith.extf %193 : vector<3x4xbf16> to vector<3x4xf32>
    %c36 = arith.constant 36 : index
    %c0_275 = arith.constant 0 : index
    %195 = vector.load %arg6[%c36, %c0_275] : memref<48x16xf32, #tpu.memory_space<vmem>>, vector<3x4xf32>
    tpu.vector_store %arg6[%c36, %c0_275], %194 {strides = array<i32>} : memref<48x16xf32, #tpu.memory_space<vmem>>, vector<3x4xf32>,
    %c0_276 = arith.constant 0 : index
    %c0_277 = arith.constant 0 : index
    %c4_278 = arith.constant 4 : index
    %c0_279 = arith.constant 0 : index
    %196 = vector.load %arg1[%c0_276, %c0_277, %c4_278, %c0_279] : memref<1x3x7x7xbf16, #tpu.memory_space<vmem>>, vector<1x3x1x4xbf16>
    %197 = vector.shape_cast %196 : vector<1x3x1x4xbf16> to vector<3x4xbf16>
    %198 = arith.extf %197 : vector<3x4xbf16> to vector<3x4xf32>
    %c36_280 = arith.constant 36 : index
    %c4_281 = arith.constant 4 : index
    %199 = vector.load %arg6[%c36_280, %c4_281] : memref<48x16xf32, #tpu.memory_space<vmem>>, vector<3x4xf32>
    tpu.vector_store %arg6[%c36_280, %c4_281], %198 {strides = array<i32>} : memref<48x16xf32, #tpu.memory_space<vmem>>, vector<3x4xf32>,
    %c0_282 = arith.constant 0 : index
    %c0_283 = arith.constant 0 : index
    %c5_284 = arith.constant 5 : index
    %c0_285 = arith.constant 0 : index
    %200 = vector.load %arg1[%c0_282, %c0_283, %c5_284, %c0_285] : memref<1x3x7x7xbf16, #tpu.memory_space<vmem>>, vector<1x3x1x4xbf16>
    %201 = vector.shape_cast %200 : vector<1x3x1x4xbf16> to vector<3x4xbf16>
    %202 = arith.extf %201 : vector<3x4xbf16> to vector<3x4xf32>
    %c36_286 = arith.constant 36 : index
    %c8_287 = arith.constant 8 : index
    %203 = vector.load %arg6[%c36_286, %c8_287] : memref<48x16xf32, #tpu.memory_space<vmem>>, vector<3x4xf32>
    tpu.vector_store %arg6[%c36_286, %c8_287], %202 {strides = array<i32>} : memref<48x16xf32, #tpu.memory_space<vmem>>, vector<3x4xf32>,
    %c0_288 = arith.constant 0 : index
    %c0_289 = arith.constant 0 : index
    %c6_290 = arith.constant 6 : index
    %c0_291 = arith.constant 0 : index
    %204 = vector.load %arg1[%c0_288, %c0_289, %c6_290, %c0_291] : memref<1x3x7x7xbf16, #tpu.memory_space<vmem>>, vector<1x3x1x4xbf16>
    %205 = vector.shape_cast %204 : vector<1x3x1x4xbf16> to vector<3x4xbf16>
    %206 = arith.extf %205 : vector<3x4xbf16> to vector<3x4xf32>
    %c36_292 = arith.constant 36 : index
    %c12_293 = arith.constant 12 : index
    %207 = vector.load %arg6[%c36_292, %c12_293] : memref<48x16xf32, #tpu.memory_space<vmem>>, vector<3x4xf32>
    tpu.vector_store %arg6[%c36_292, %c12_293], %206 {strides = array<i32>} : memref<48x16xf32, #tpu.memory_space<vmem>>, vector<3x4xf32>,
    %c0_294 = arith.constant 0 : index
    %c0_295 = arith.constant 0 : index
    %c3_296 = arith.constant 3 : index
    %c1_297 = arith.constant 1 : index
    %208 = vector.load %arg1[%c0_294, %c0_295, %c3_296, %c1_297] : memref<1x3x7x7xbf16, #tpu.memory_space<vmem>>, vector<1x3x1x4xbf16>
    %209 = vector.shape_cast %208 : vector<1x3x1x4xbf16> to vector<3x4xbf16>
    %210 = arith.extf %209 : vector<3x4xbf16> to vector<3x4xf32>
    %c39 = arith.constant 39 : index
    %c0_298 = arith.constant 0 : index
    %211 = vector.load %arg6[%c39, %c0_298] : memref<48x16xf32, #tpu.memory_space<vmem>>, vector<3x4xf32>
    tpu.vector_store %arg6[%c39, %c0_298], %210 {strides = array<i32>} : memref<48x16xf32, #tpu.memory_space<vmem>>, vector<3x4xf32>,
    %c0_299 = arith.constant 0 : index
    %c0_300 = arith.constant 0 : index
    %c4_301 = arith.constant 4 : index
    %c1_302 = arith.constant 1 : index
    %212 = vector.load %arg1[%c0_299, %c0_300, %c4_301, %c1_302] : memref<1x3x7x7xbf16, #tpu.memory_space<vmem>>, vector<1x3x1x4xbf16>
    %213 = vector.shape_cast %212 : vector<1x3x1x4xbf16> to vector<3x4xbf16>
    %214 = arith.extf %213 : vector<3x4xbf16> to vector<3x4xf32>
    %c39_303 = arith.constant 39 : index
    %c4_304 = arith.constant 4 : index
    %215 = vector.load %arg6[%c39_303, %c4_304] : memref<48x16xf32, #tpu.memory_space<vmem>>, vector<3x4xf32>
    tpu.vector_store %arg6[%c39_303, %c4_304], %214 {strides = array<i32>} : memref<48x16xf32, #tpu.memory_space<vmem>>, vector<3x4xf32>,
    %c0_305 = arith.constant 0 : index
    %c0_306 = arith.constant 0 : index
    %c5_307 = arith.constant 5 : index
    %c1_308 = arith.constant 1 : index
    %216 = vector.load %arg1[%c0_305, %c0_306, %c5_307, %c1_308] : memref<1x3x7x7xbf16, #tpu.memory_space<vmem>>, vector<1x3x1x4xbf16>
    %217 = vector.shape_cast %216 : vector<1x3x1x4xbf16> to vector<3x4xbf16>
    %218 = arith.extf %217 : vector<3x4xbf16> to vector<3x4xf32>
    %c39_309 = arith.constant 39 : index
    %c8_310 = arith.constant 8 : index
    %219 = vector.load %arg6[%c39_309, %c8_310] : memref<48x16xf32, #tpu.memory_space<vmem>>, vector<3x4xf32>
    tpu.vector_store %arg6[%c39_309, %c8_310], %218 {strides = array<i32>} : memref<48x16xf32, #tpu.memory_space<vmem>>, vector<3x4xf32>,
    %c0_311 = arith.constant 0 : index
    %c0_312 = arith.constant 0 : index
    %c6_313 = arith.constant 6 : index
    %c1_314 = arith.constant 1 : index
    %220 = vector.load %arg1[%c0_311, %c0_312, %c6_313, %c1_314] : memref<1x3x7x7xbf16, #tpu.memory_space<vmem>>, vector<1x3x1x4xbf16>
    %221 = vector.shape_cast %220 : vector<1x3x1x4xbf16> to vector<3x4xbf16>
    %222 = arith.extf %221 : vector<3x4xbf16> to vector<3x4xf32>
    %c39_315 = arith.constant 39 : index
    %c12_316 = arith.constant 12 : index
    %223 = vector.load %arg6[%c39_315, %c12_316] : memref<48x16xf32, #tpu.memory_space<vmem>>, vector<3x4xf32>
    tpu.vector_store %arg6[%c39_315, %c12_316], %222 {strides = array<i32>} : memref<48x16xf32, #tpu.memory_space<vmem>>, vector<3x4xf32>,
    %c0_317 = arith.constant 0 : index
    %c0_318 = arith.constant 0 : index
    %c3_319 = arith.constant 3 : index
    %c2_320 = arith.constant 2 : index
    %224 = vector.load %arg1[%c0_317, %c0_318, %c3_319, %c2_320] : memref<1x3x7x7xbf16, #tpu.memory_space<vmem>>, vector<1x3x1x4xbf16>
    %225 = vector.shape_cast %224 : vector<1x3x1x4xbf16> to vector<3x4xbf16>
    %226 = arith.extf %225 : vector<3x4xbf16> to vector<3x4xf32>
    %c42 = arith.constant 42 : index
    %c0_321 = arith.constant 0 : index
    %227 = vector.load %arg6[%c42, %c0_321] : memref<48x16xf32, #tpu.memory_space<vmem>>, vector<3x4xf32>
    tpu.vector_store %arg6[%c42, %c0_321], %226 {strides = array<i32>} : memref<48x16xf32, #tpu.memory_space<vmem>>, vector<3x4xf32>,
    %c0_322 = arith.constant 0 : index
    %c0_323 = arith.constant 0 : index
    %c4_324 = arith.constant 4 : index
    %c2_325 = arith.constant 2 : index
    %228 = vector.load %arg1[%c0_322, %c0_323, %c4_324, %c2_325] : memref<1x3x7x7xbf16, #tpu.memory_space<vmem>>, vector<1x3x1x4xbf16>
    %229 = vector.shape_cast %228 : vector<1x3x1x4xbf16> to vector<3x4xbf16>
    %230 = arith.extf %229 : vector<3x4xbf16> to vector<3x4xf32>
    %c42_326 = arith.constant 42 : index
    %c4_327 = arith.constant 4 : index
    %231 = vector.load %arg6[%c42_326, %c4_327] : memref<48x16xf32, #tpu.memory_space<vmem>>, vector<3x4xf32>
    tpu.vector_store %arg6[%c42_326, %c4_327], %230 {strides = array<i32>} : memref<48x16xf32, #tpu.memory_space<vmem>>, vector<3x4xf32>,
    %c0_328 = arith.constant 0 : index
    %c0_329 = arith.constant 0 : index
    %c5_330 = arith.constant 5 : index
    %c2_331 = arith.constant 2 : index
    %232 = vector.load %arg1[%c0_328, %c0_329, %c5_330, %c2_331] : memref<1x3x7x7xbf16, #tpu.memory_space<vmem>>, vector<1x3x1x4xbf16>
    %233 = vector.shape_cast %232 : vector<1x3x1x4xbf16> to vector<3x4xbf16>
    %234 = arith.extf %233 : vector<3x4xbf16> to vector<3x4xf32>
    %c42_332 = arith.constant 42 : index
    %c8_333 = arith.constant 8 : index
    %235 = vector.load %arg6[%c42_332, %c8_333] : memref<48x16xf32, #tpu.memory_space<vmem>>, vector<3x4xf32>
    tpu.vector_store %arg6[%c42_332, %c8_333], %234 {strides = array<i32>} : memref<48x16xf32, #tpu.memory_space<vmem>>, vector<3x4xf32>,
    %c0_334 = arith.constant 0 : index
    %c0_335 = arith.constant 0 : index
    %c6_336 = arith.constant 6 : index
    %c2_337 = arith.constant 2 : index
    %236 = vector.load %arg1[%c0_334, %c0_335, %c6_336, %c2_337] : memref<1x3x7x7xbf16, #tpu.memory_space<vmem>>, vector<1x3x1x4xbf16>
    %237 = vector.shape_cast %236 : vector<1x3x1x4xbf16> to vector<3x4xbf16>
    %238 = arith.extf %237 : vector<3x4xbf16> to vector<3x4xf32>
    %c42_338 = arith.constant 42 : index
    %c12_339 = arith.constant 12 : index
    %239 = vector.load %arg6[%c42_338, %c12_339] : memref<48x16xf32, #tpu.memory_space<vmem>>, vector<3x4xf32>
    tpu.vector_store %arg6[%c42_338, %c12_339], %238 {strides = array<i32>} : memref<48x16xf32, #tpu.memory_space<vmem>>, vector<3x4xf32>,
    %c0_340 = arith.constant 0 : index
    %c0_341 = arith.constant 0 : index
    %c3_342 = arith.constant 3 : index
    %c3_343 = arith.constant 3 : index
    %240 = vector.load %arg1[%c0_340, %c0_341, %c3_342, %c3_343] : memref<1x3x7x7xbf16, #tpu.memory_space<vmem>>, vector<1x3x1x4xbf16>
    %241 = vector.shape_cast %240 : vector<1x3x1x4xbf16> to vector<3x4xbf16>
    %242 = arith.extf %241 : vector<3x4xbf16> to vector<3x4xf32>
    %c45 = arith.constant 45 : index
    %c0_344 = arith.constant 0 : index
    %243 = vector.load %arg6[%c45, %c0_344] : memref<48x16xf32, #tpu.memory_space<vmem>>, vector<3x4xf32>
    tpu.vector_store %arg6[%c45, %c0_344], %242 {strides = array<i32>} : memref<48x16xf32, #tpu.memory_space<vmem>>, vector<3x4xf32>,
    %c0_345 = arith.constant 0 : index
    %c0_346 = arith.constant 0 : index
    %c4_347 = arith.constant 4 : index
    %c3_348 = arith.constant 3 : index
    %244 = vector.load %arg1[%c0_345, %c0_346, %c4_347, %c3_348] : memref<1x3x7x7xbf16, #tpu.memory_space<vmem>>, vector<1x3x1x4xbf16>
    %245 = vector.shape_cast %244 : vector<1x3x1x4xbf16> to vector<3x4xbf16>
    %246 = arith.extf %245 : vector<3x4xbf16> to vector<3x4xf32>
    %c45_349 = arith.constant 45 : index
    %c4_350 = arith.constant 4 : index
    %247 = vector.load %arg6[%c45_349, %c4_350] : memref<48x16xf32, #tpu.memory_space<vmem>>, vector<3x4xf32>
    tpu.vector_store %arg6[%c45_349, %c4_350], %246 {strides = array<i32>} : memref<48x16xf32, #tpu.memory_space<vmem>>, vector<3x4xf32>,
    %c0_351 = arith.constant 0 : index
    %c0_352 = arith.constant 0 : index
    %c5_353 = arith.constant 5 : index
    %c3_354 = arith.constant 3 : index
    %248 = vector.load %arg1[%c0_351, %c0_352, %c5_353, %c3_354] : memref<1x3x7x7xbf16, #tpu.memory_space<vmem>>, vector<1x3x1x4xbf16>
    %249 = vector.shape_cast %248 : vector<1x3x1x4xbf16> to vector<3x4xbf16>
    %250 = arith.extf %249 : vector<3x4xbf16> to vector<3x4xf32>
    %c45_355 = arith.constant 45 : index
    %c8_356 = arith.constant 8 : index
    %251 = vector.load %arg6[%c45_355, %c8_356] : memref<48x16xf32, #tpu.memory_space<vmem>>, vector<3x4xf32>
    tpu.vector_store %arg6[%c45_355, %c8_356], %250 {strides = array<i32>} : memref<48x16xf32, #tpu.memory_space<vmem>>, vector<3x4xf32>,
    %c0_357 = arith.constant 0 : index
    %c0_358 = arith.constant 0 : index
    %c6_359 = arith.constant 6 : index
    %c3_360 = arith.constant 3 : index
    %252 = vector.load %arg1[%c0_357, %c0_358, %c6_359, %c3_360] : memref<1x3x7x7xbf16, #tpu.memory_space<vmem>>, vector<1x3x1x4xbf16>
    %253 = vector.shape_cast %252 : vector<1x3x1x4xbf16> to vector<3x4xbf16>
    %254 = arith.extf %253 : vector<3x4xbf16> to vector<3x4xf32>
    %c45_361 = arith.constant 45 : index
    %c12_362 = arith.constant 12 : index
    %255 = vector.load %arg6[%c45_361, %c12_362] : memref<48x16xf32, #tpu.memory_space<vmem>>, vector<3x4xf32>
    tpu.vector_store %arg6[%c45_361, %c12_362], %254 {strides = array<i32>} : memref<48x16xf32, #tpu.memory_space<vmem>>, vector<3x4xf32>,
    %c0_363 = arith.constant 0 : index
    %c0_364 = arith.constant 0 : index
    %256 = vector.load %arg2[%c0_363, %c0_364] : memref<8x48xf32, #tpu.memory_space<vmem>>, vector<8x48xf32>
    %c0_365 = arith.constant 0 : index
    %c0_366 = arith.constant 0 : index
    %257 = vector.load %arg6[%c0_365, %c0_366] : memref<48x16xf32, #tpu.memory_space<vmem>>, vector<48x16xf32>
    %cst = arith.constant dense<0.000000e+00> : vector<8x16xf32>
    %258 = tpu.matmul %256, %257, %cst {dimension_numbers = #tpu.dot_dimension_numbers<[1], [0], [0], [1], [0, 0, 1, 1], [], []>} : vector<8x48xf32>, vector<48x16xf32>, vector<8x16xf32> -> vector<8x16xf32>
    %c0_367 = arith.constant 0 : index
    %c0_368 = arith.constant 0 : index
    %259 = vector.load %arg3[%c0_367, %c0_368] : memref<8x1xf32, #tpu.memory_space<vmem>>, vector<8x1xf32>
    %260 = vector.broadcast %259 : vector<8x1xf32> to vector<8x16xf32>
    %261 = arith.addf %258, %260 : vector<8x16xf32>
    %cst_369 = arith.constant 0.000000e+00 : f32
    %262 = vector.broadcast %cst_369 : f32 to vector<8x16xf32>
    %263 = arith.subf %262, %261 : vector<8x16xf32>
    %264 = math.exp %263 : vector<8x16xf32>
    %cst_370 = arith.constant 1.000000e+00 : f32
    %265 = vector.broadcast %cst_370 : f32 to vector<8x16xf32>
    %266 = arith.addf %265, %264 : vector<8x16xf32>
    %267 = tpu.reciprocal %266 {approx = true} : vector<8x16xf32> -> vector<8x16xf32>
    %c0_371 = arith.constant 0 : index
    %c0_372 = arith.constant 0 : index
    %c0_373 = arith.constant 0 : index
    %268 = vector.load %arg5[%c0_371, %c0_372, %c0_373] : memref<1x8x16xf32, #tpu.memory_space<vmem>>, vector<1x8x16xf32>
    %269 = vector.shape_cast %268 : vector<1x8x16xf32> to vector<8x16xf32>
    %270 = vector.shape_cast %267 : vector<8x16xf32> to vector<1x8x16xf32>
    tpu.vector_store %arg5[%c0_371, %c0_372, %c0_373], %270 {strides = array<i32>} : memref<1x8x16xf32, #tpu.memory_space<vmem>>, vector<1x8x16xf32>,
    %271 = arith.mulf %261, %267 : vector<8x16xf32>
    %c0_374 = arith.constant 0 : index
    %c0_375 = arith.constant 0 : index
    %c0_376 = arith.constant 0 : index
    %272 = vector.load %arg4[%c0_374, %c0_375, %c0_376] : memref<1x8x16xf32, #tpu.memory_space<vmem>>, vector<1x8x16xf32>
    %273 = vector.shape_cast %272 : vector<1x8x16xf32> to vector<8x16xf32>
    %274 = vector.shape_cast %271 : vector<8x16xf32> to vector<1x8x16xf32>
    tpu.vector_store %arg4[%c0_374, %c0_375, %c0_376], %274 {strides = array<i32>} : memref<1x8x16xf32, #tpu.memory_space<vmem>>, vector<1x8x16xf32>,
    return
  }
  func.func @transform_0(%arg0: i32) -> (i32, i32, i32, i32) {
    %c0_i32 = arith.constant 0 : i32
    %c0_i32_0 = arith.constant 0 : i32
    %c0_i32_1 = arith.constant 0 : i32
    %c0_i32_2 = arith.constant 0 : i32
    return %arg0, %c0_i32, %c0_i32_0, %c0_i32_1 : i32, i32, i32, i32
  }
  func.func @transform_1(%arg0: i32) -> (i32, i32) {
    %c0_i32 = arith.constant 0 : i32
    %c0_i32_0 = arith.constant 0 : i32
    %c0_i32_1 = arith.constant 0 : i32
    return %c0_i32, %c0_i32_0 : i32, i32
  }
  func.func @transform_2(%arg0: i32) -> (i32, i32) {
    %c0_i32 = arith.constant 0 : i32
    %c0_i32_0 = arith.constant 0 : i32
    %c0_i32_1 = arith.constant 0 : i32
    return %c0_i32, %c0_i32_0 : i32, i32
  }
  func.func @transform_3(%arg0: i32) -> (i32, i32, i32) {
    %c0_i32 = arith.constant 0 : i32
    %c0_i32_0 = arith.constant 0 : i32
    %c0_i32_1 = arith.constant 0 : i32
    return %arg0, %c0_i32, %c0_i32_0 : i32, i32, i32
  }
  func.func @transform_4(%arg0: i32) -> (i32, i32, i32) {
    %c0_i32 = arith.constant 0 : i32
    %c0_i32_0 = arith.constant 0 : i32
    %c0_i32_1 = arith.constant 0 : i32
    return %arg0, %c0_i32, %c0_i32_0 : i32, i32, i32
  }
}

</mosaic_0001>

<bundles_post_ra>
// kernel: model_forward.1
= control target key start
LH: loop header
LB: loop body
LE: loop exit
PB: predicated region body
PF: predicated region fallthrough
CT: control target
= control target key end

     0   :  { %s1780_s15 = smov 0   ;;  %s2233_s0 = inlined_call_operand.vmem [shape: bf16[2,3,7,7], index: 0, kind: input, shape index: {}]   ;;  %s2234_s1 = inlined_call_operand.vmem [shape: f32[8,48], index: 1, kind: input, shape index: {}]   ;;  %s2235_s2 = inlined_call_operand.vmem [shape: f32[8,1], index: 2, kind: input, shape index: {}]   ;;  %s2236_s3 = inlined_call_operand.vmem [shape: f32[2,8,16], index: 3, kind: output, shape index: {0}]   ;;  %s2237_s4 = inlined_call_operand.vmem [shape: f32[2,8,16], index: 4, kind: output, shape index: {1}]  }
   0x1 LB: > { %s1503_s16 = sadd.s32 4294967295, %s1734_s15   ;;  %p1507_p0 = scmp.ge.s32.totalorder %s1734_s15, 1  ;;  %s1734_s15 = sphi %s1780_s15, %s15_s15  }
   0x2   : > { %p165_p1 = scmp.lt.s32.totalorder %s1734_s15, 3 }
   0x4   : > { %p166_p2 = pnand %p1507_p0, %p165_p1 }
   0x5   : > { %p194_p3 = scmp.lt.s32.totalorder (!%p166_p2), %s1503_s16, 1  ;;  %vm217_vm0 = vcmask (!%p166_p2), 1041409   ;;  %vm220_vm1 = vcmask (!%p166_p2), 1042434   ;;  %vm237_vm2 = vcmask (!%p166_p2), 1043459   ;;  %vm256_vm3 = vcmask (!%p166_p2), 1044484   ;;  %s1736_s21 = smov (!%p166_p2), 125  }
   0x6   : > { %169 = sbr.rel (%p166_p2) target bundleno = 513 (0x201), region = 32  ;;  %s1737_s22 = smov (!%p166_p2), 127   ;;  %vm275_vm4 = vcmask (!%p166_p2), 1045509   ;;  %vm550_vm5 = vcmask (!%p166_p2), 1046534   ;;  %vm825_vm6 = vcmask (!%p166_p2), 1047559   ;;  %vm500_vm7 = vcmask (!%p166_p2), 27649  }
   0x7   : > { %s1738_s23 = smov (!%p166_p2), 126   ;;  %s1739_s24 = smov (!%p166_p2), 4   ;;  %vm223_vm8 = vcmask (!%p166_p2), 26624   ;;  %vm775_vm9 = vcmask (!%p166_p2), 28674   ;;  %vm1752_vm10 = vmmov (!%p166_p2), 0   ;;  %vm1050_vm11 = vcmask (!%p166_p2), 29699  }
   0x8   : > { %s1740_s25 = smov (!%p166_p2), 3   ;;  %s1741_s26 = smov (!%p166_p2), 2   ;;  %vm242_vm12 = vcmask (!%p166_p2), 60449   ;;  %vm518_vm13 = vcmask (!%p166_p2), 61474   ;;  %vm261_vm14 = vcmask (!%p166_p2), 94274   ;;  %vm536_vm15 = vcmask (!%p166_p2), 95299  }
   0x9   : > { %s1742_s27 = smov (!%p166_p2), 1   ;;  %s1743_s28 = smov (!%p166_p2), 8  }
   0xa   : > { %s1744_s29 = smov (!%p166_p2), 7   ;;  %s1745_s30 = smov (!%p166_p2), 6  }
   0xb   : > { %s1746_s5 = smov (!%p166_p2), 5   ;;  %s1747_s6 = smov (!%p166_p2), 12  }
   0xc   : > { %s1748_s7 = smov (!%p166_p2), 11   ;;  %s1749_s8 = smov (!%p166_p2), 10  }
   0xd   : > { %s2239_s16 = smov (!%p194_p3, %s1503_s16), 1  ;;  %s1750_s9 = smov 9  }
   0xe   : > { %s1545_s17 = smul.u32 12, %s2239_s16  ;;  %s1509_s14 = sshll.u32 %s2239_s16, 3 }
   0xf   : > { %s206_s19 = scalar_lea.vmem %s2237_s4, %s1509_s14 }
  0x10   : > { %s1794_s20 = scalar_lea.vmem %s2233_s0, %s1545_s17 }
  0x11   : > { %v418_v0 = vld [vmem:[%s1794_s20] sm:$0x1]  ;;  %v419_v1 = vld [vmem:[%s1794_s20 + $0x4] sm:$0x1]  ;;  %v420_v2 = vld [vmem:[%s1794_s20 + $0x8] sm:$0x1] }
  0x12   : > { %v421_v3 = vunpack.c.l.bf16 %v418_v0  ;;  %v422_v4 = vunpack.c.l.bf16 %v419_v1  ;;  %v423_v5 = vunpack.c.l.bf16 %v420_v2  ;;  %v693_v6 = vld [vmem:[%s1794_s20] sm:$0x1]  ;;  %v694_v7 = vld [vmem:[%s1794_s20 + $0x4] sm:$0x1]  ;;  %v695_v8 = vld [vmem:[%s1794_s20 + $0x8] sm:$0x1] }
  0x13   : > { %v696_v9 = vunpack.c.l.bf16 %v693_v6  ;;  %v697_v10 = vunpack.c.l.bf16 %v694_v7  ;;  %v698_v11 = vunpack.c.l.bf16 %v695_v8  ;;  %v282_v12 = vld [vmem:[%s1794_s20] sm:$0x1]  ;;  %v283_v13 = vld [vmem:[%s1794_s20 + $0x4] sm:$0x1]  ;;  %v284_v14 = vld [vmem:[%s1794_s20 + $0x8] sm:$0x1] }
  0x14   : > { %v427_v15 = vrot.slane %v422_v4, 7  ;;  %v429_v16 = vrot.slane %v423_v5, 6  ;;  %v285_v17 = vunpack.c.l.bf16 %v282_v12  ;;  %v286_v18 = vunpack.c.l.bf16 %v283_v13  ;;  %v557_v19 = vld [vmem:[%s1794_s20] sm:$0x1]  ;;  %v558_v20 = vld [vmem:[%s1794_s20 + $0x4] sm:$0x1] }
  0x15   : > { %v702_v21 = vrot.slane %v697_v10, 7  ;;  %v704_v22 = vrot.slane %v698_v11, 6  ;;  %v287_v23 = vunpack.c.l.bf16 %v284_v14  ;;  %v559_v24 = vld [vmem:[%s1794_s20 + $0x8] sm:$0x1]  ;;  %v560_v25 = vunpack.c.l.bf16 %v557_v19  ;;  %v350_v26 = vld [vmem:[%s1794_s20] sm:$0x1] }
  0x16   : > { %v428_v27 = vsel %vm217_vm0, %v427_v15, %v421_v3  ;;  %v291_v28 = vrot.slane %v286_v18, 7  ;;  %v561_v29 = vunpack.c.l.bf16 %v558_v20  ;;  %v562_v30 = vunpack.c.l.bf16 %v559_v24  ;;  %v351_v31 = vld [vmem:[%s1794_s20 + $0x4] sm:$0x1]  ;;  %v352_v32 = vld [vmem:[%s1794_s20 + $0x8] sm:$0x1] }
  0x17   : > { %v430_v33 = vsel %vm220_vm1, %v429_v16, %v428_v27  ;;  %v703_v34 = vsel %vm220_vm1, %v702_v21, %v696_v9  ;;  %v293_v35 = vrot.slane %v287_v23, 6  ;;  %v353_v36 = vunpack.c.l.bf16 %v350_v26  ;;  %v625_v37 = vld [vmem:[%s1794_s20] sm:$0x1]  ;;  %v626_v38 = vld [vmem:[%s1794_s20 + $0x4] sm:$0x1] }
  0x18   : > { %v705_v39 = vsel %vm237_vm2, %v704_v22, %v703_v34  ;;  %v292_v40 = vsel %vm217_vm0, %v291_v28, %v285_v17  ;;  %v566_v41 = vrot.slane %v561_v29, 7  ;;  %v568_v42 = vrot.slane %v562_v30, 6  ;;  %v627_v43 = vld [vmem:[%s1794_s20 + $0x8] sm:$0x1]  ;;  %v225_v44 = vld [vmem:[%s1794_s20] sm:$0x1] }
  0x19   : > { %v1583_v45 = vpack.i.bf16 %v705_v39, %v430_v33  ;;  %v294_v46 = vsel %vm220_vm1, %v293_v35, %v292_v40  ;;  %v354_v47 = vunpack.c.l.bf16 %v351_v31  ;;  %v355_v48 = vunpack.c.l.bf16 %v352_v32  ;;  %v226_v49 = vld [vmem:[%s1794_s20 + $0x4] sm:$0x1]  ;;  %v227_v54 = vld [vmem:[%s1794_s20 + $0x8] sm:$0x1]  ;;  %v502_v55 = vld [vmem:[%s1794_s20] sm:$0x2] }
  0x1a   : > { %v567_v50 = vsel %vm220_vm1, %v566_v41, %v560_v25  ;;  %v628_v51 = vunpack.c.l.bf16 %v625_v37  ;;  %v629_v52 = vunpack.c.l.bf16 %v626_v38  ;;  %v630_v53 = vunpack.c.l.bf16 %v627_v43  ;;  %v503_v56 = vld [vmem:[%s1794_s20 + $0x4] sm:$0x2]  ;;  %v504_v61 = vld [vmem:[%s1794_s20 + $0x8] sm:$0x2]  ;;  %v299_v2 = vld [vmem:[%s1794_s20] sm:$0x1] }
  0x1b   : > { %1584 = vrot.lane.b32.xlu1 %v1583_v45, %s1736_s21  ;;  %v569_v57 = vsel %vm237_vm2, %v568_v42, %v567_v50  ;;  %v359_v58 = vrot.slane %v354_v47, 7  ;;  %v361_v59 = vrot.slane %v355_v48, 6  ;;  %v228_v60 = vunpack.c.l.bf16 %v225_v44  ;;  %v300_v7 = vld [vmem:[%s1794_s20 + $0x4] sm:$0x1]  ;;  %v301_v12 = vld [vmem:[%s1794_s20 + $0x8] sm:$0x1] }
  0x1c   : > { %v1573_v62 = vpack.i.bf16 %v569_v57, %v294_v46  ;;  %v634_v63 = vrot.slane %v629_v52, 7  ;;  %v636_v0 = vrot.slane %v630_v53, 6  ;;  %v229_v1 = vunpack.c.l.bf16 %v226_v49  ;;  %v574_v13 = vld [vmem:[%s1794_s20] sm:$0x2]  ;;  %v575_v18 = vld [vmem:[%s1794_s20 + $0x4] sm:$0x2] }
  0x1d   : > { %v360_v3 = vsel %vm217_vm0, %v359_v58, %v353_v36  ;;  %v230_v4 = vunpack.c.l.bf16 %v227_v54  ;;  %v505_v5 = vunpack.c.l.bf16 %v502_v55  ;;  %v506_v6 = vunpack.c.l.bf16 %v503_v56  ;;  %v576_v19 = vld [vmem:[%s1794_s20 + $0x8] sm:$0x2]  ;;  %v367_v24 = vld [vmem:[%s1794_s20] sm:$0x1]  ;;  %v368_v25 = vld [vmem:[%s1794_s20 + $0x4] sm:$0x1] }
  0x1e   : > { %1574 = vrot.lane.b32.xlu0 %v1573_v62, %s1737_s22  ;;  %v362_v8 = vsel %vm220_vm1, %v361_v59, %v360_v3  ;;  %v635_v9 = vsel %vm220_vm1, %v634_v63, %v628_v51  ;;  %v234_v10 = vrot.slane %v229_v1, 7  ;;  %v507_v11 = vunpack.c.l.bf16 %v504_v61  ;;  %v369_v30 = vld [vmem:[%s1794_s20 + $0x8] sm:$0x1]  ;;  %v642_v35 = vld [vmem:[%s1794_s20] sm:$0x2] }
  0x1f   : > { %v637_v14 = vsel %vm237_vm2, %v636_v0, %v635_v9  ;;  %v236_v15 = vrot.slane %v230_v4, 6  ;;  %v511_v16 = vrot.slane %v506_v6, 7  ;;  %v302_v17 = vunpack.c.l.bf16 %v299_v2  ;;  %v643_v36 = vld [vmem:[%s1794_s20 + $0x4] sm:$0x2]  ;;  %v644_v41 = vld [vmem:[%s1794_s20 + $0x8] sm:$0x2] }
  0x20   : > { %v1578_v20 = vpack.i.bf16 %v637_v14, %v362_v8  ;;  %v235_v21 = vsel %vm220_vm1, %v234_v10, %v228_v60  ;;  %v513_v22 = vrot.slane %v507_v11, 6  ;;  %v303_v23 = vunpack.c.l.bf16 %v300_v7  ;;  %v435_v42 = vld [vmem:[%s1794_s20] sm:$0x1]  ;;  %v436_v47 = vld [vmem:[%s1794_s20 + $0x4] sm:$0x1] }
  0x21   : > { %v238_v26 = vsel %vm237_vm2, %v236_v15, %v235_v21  ;;  %v512_v27 = vsel %vm237_vm2, %v511_v16, %v505_v5  ;;  %v304_v28 = vunpack.c.l.bf16 %v301_v12  ;;  %v577_v29 = vunpack.c.l.bf16 %v574_v13  ;;  %v437_v52 = vld [vmem:[%s1794_s20 + $0x8] sm:$0x1]  ;;  %v710_v57 = vld [vmem:[%s1794_s20] sm:$0x2]  ;;  %v711_v58 = vld [vmem:[%s1794_s20 + $0x4] sm:$0x2] }
  0x22   : > { %1579 = vrot.lane.b32.xlu0 %v1578_v20, %s1738_s23  ;;  %v514_v31 = vsel %vm256_vm3, %v513_v22, %v512_v27  ;;  %v308_v32 = vrot.slane %v303_v23, 7  ;;  %v578_v33 = vunpack.c.l.bf16 %v575_v18  ;;  %v579_v34 = vunpack.c.l.bf16 %v576_v19  ;;  %v712_v63 = vld [vmem:[%s1794_s20 + $0x8] sm:$0x2]  ;;  %v244_v0 = vld [vmem:[%s1794_s20] sm:$0x2] }
  0x23   : > { %v1588_v37 = vpack.i.bf16 %v514_v31, %v238_v26  ;;  %v310_v38 = vrot.slane %v304_v28, 6  ;;  %v370_v39 = vunpack.c.l.bf16 %v367_v24  ;;  %v371_v40 = vunpack.c.l.bf16 %v368_v25  ;;  %v245_v5 = vld [vmem:[%s1794_s20 + $0x4] sm:$0x2]  ;;  %v246_v10 = vld [vmem:[%s1794_s20 + $0x8] sm:$0x2] }
  0x24   : > { %v309_v43 = vsel %vm220_vm1, %v308_v32, %v302_v17  ;;  %v583_v44 = vrot.slane %v578_v33, 7  ;;  %v585_v45 = vrot.slane %v579_v34, 6  ;;  %v372_v46 = vunpack.c.l.bf16 %v369_v30  ;;  %v520_v11 = vld [vmem:[%s1794_s20] sm:$0x2]  ;;  %v521_v16 = vld [vmem:[%s1794_s20 + $0x4] sm:$0x2] }
  0x25   : > { %1589 = vrot.lane.b32.xlu1 %v1588_v37, %s1739_s24  ;;  %v311_v48 = vsel %vm237_vm2, %v310_v38, %v309_v43  ;;  %v376_v49 = vrot.slane %v371_v40, 7  ;;  %v645_v50 = vunpack.c.l.bf16 %v642_v35  ;;  %v646_v51 = vunpack.c.l.bf16 %v643_v36  ;;  %v522_v17 = vld [vmem:[%s1794_s20 + $0x8] sm:$0x2]  ;;  %v316_v22 = vld [vmem:[%s1794_s20] sm:$0x2] }
  0x26   : > { %v584_v53 = vsel %vm237_vm2, %v583_v44, %v577_v29  ;;  %v378_v54 = vrot.slane %v372_v46, 6  ;;  %v647_v55 = vunpack.c.l.bf16 %v644_v41  ;;  %v438_v56 = vunpack.c.l.bf16 %v435_v42  ;;  %v317_v23 = vld [vmem:[%s1794_s20 + $0x4] sm:$0x2]  ;;  %v318_v28 = vld [vmem:[%s1794_s20 + $0x8] sm:$0x2] }
  0x27   : > { %v586_v59 = vsel %vm256_vm3, %v585_v45, %v584_v53  ;;  %v377_v60 = vsel %vm220_vm1, %v376_v49, %v370_v39  ;;  %v651_v61 = vrot.slane %v646_v51, 7  ;;  %v439_v62 = vunpack.c.l.bf16 %v436_v47  ;;  %v591_v33 = vld [vmem:[%s1794_s20] sm:$0x2]  ;;  %v592_v34 = vld [vmem:[%s1794_s20 + $0x4] sm:$0x2] }
  0x28   : > { %v1593_v1 = vpack.i.bf16 %v586_v59, %v311_v48  ;;  %v379_v2 = vsel %vm237_vm2, %v378_v54, %v377_v60  ;;  %v653_v3 = vrot.slane %v647_v55, 6  ;;  %v440_v4 = vunpack.c.l.bf16 %v437_v52  ;;  %v593_v39 = vld [vmem:[%s1794_s20 + $0x8] sm:$0x2]  ;;  %v384_v40 = vld [vmem:[%s1794_s20] sm:$0x2] }
  0x29   : > { %v652_v6 = vsel %vm237_vm2, %v651_v61, %v645_v50  ;;  %v444_v7 = vrot.slane %v439_v62, 7  ;;  %v713_v8 = vunpack.c.l.bf16 %v710_v57  ;;  %v714_v9 = vunpack.c.l.bf16 %v711_v58  ;;  %v385_v45 = vld [vmem:[%s1794_s20 + $0x4] sm:$0x2]  ;;  %v386_v50 = vld [vmem:[%s1794_s20 + $0x8] sm:$0x2] }
  0x2a   : > { %1594 = vrot.lane.b32.xlu0 %v1593_v1, %s1740_s25  ;;  %v654_v12 = vsel %vm256_vm3, %v653_v3, %v652_v6  ;;  %v446_v13 = vrot.slane %v440_v4, 6  ;;  %v715_v14 = vunpack.c.l.bf16 %v712_v63  ;;  %v247_v15 = vunpack.c.l.bf16 %v244_v0  ;;  %v659_v55 = vld [vmem:[%s1794_s20] sm:$0x2]  ;;  %v661_v61 = vld [vmem:[%s1794_s20 + $0x8] sm:$0x2] }
  0x2b   : > { %v1598_v18 = vpack.i.bf16 %v654_v12, %v379_v2  ;;  %v445_v19 = vsel %vm220_vm1, %v444_v7, %v438_v56  ;;  %v719_v20 = vrot.slane %v714_v9, 7  ;;  %v248_v21 = vunpack.c.l.bf16 %v245_v5  ;;  %v660_v56 = vld [vmem:[%s1794_s20 + $0x4] sm:$0x2]  ;;  %v452_v62 = vld [vmem:[%s1794_s20] sm:$0x2] }
  0x2c   : > { %v447_v24 = vsel %vm237_vm2, %v446_v13, %v445_v19  ;;  %v721_v25 = vrot.slane %v715_v14, 6  ;;  %v249_v26 = vunpack.c.l.bf16 %v246_v10  ;;  %v523_v27 = vunpack.c.l.bf16 %v520_v11  ;;  %v453_v3 = vld [vmem:[%s1794_s20 + $0x4] sm:$0x2]  ;;  %v727_v13 = vld [vmem:[%s1794_s20] sm:$0x2] }
  0x2d   : > { %1599 = vrot.lane.b32.xlu1 %v1598_v18, %s1741_s26  ;;  %v720_v29 = vsel %vm237_vm2, %v719_v20, %v713_v8  ;;  %v253_v30 = vrot.slane %v248_v21, 7  ;;  %v524_v31 = vunpack.c.l.bf16 %v521_v16  ;;  %v525_v32 = vunpack.c.l.bf16 %v522_v17  ;;  %v454_v8 = vld [vmem:[%s1794_s20 + $0x8] sm:$0x2]  ;;  %v728_v14 = vld [vmem:[%s1794_s20 + $0x4] sm:$0x2] }
  0x2e   : > { %v722_v35 = vsel %vm256_vm3, %v721_v25, %v720_v29  ;;  %v255_v36 = vrot.slane %v249_v26, 6  ;;  %v319_v37 = vunpack.c.l.bf16 %v316_v22  ;;  %v320_v38 = vunpack.c.l.bf16 %v317_v23  ;;  %v729_v19 = vld [vmem:[%s1794_s20 + $0x8] sm:$0x2]  ;;  %v263_v20 = vld [vmem:[%s1794_s20] sm:$0x2] }
  0x2f   : > { %v1603_v41 = vpack.i.bf16 %v722_v35, %v447_v24  ;;  %v254_v42 = vsel %vm237_vm2, %v253_v30, %v247_v15  ;;  %v529_v43 = vrot.slane %v524_v31, 7  ;;  %v531_v44 = vrot.slane %v525_v32, 6  ;;  %v264_v25 = vld [vmem:[%s1794_s20 + $0x4] sm:$0x2]  ;;  %v265_v30 = vld [vmem:[%s1794_s20 + $0x8] sm:$0x2] }
  0x30   : > { %v257_v46 = vsel %vm256_vm3, %v255_v36, %v254_v42  ;;  %v321_v47 = vunpack.c.l.bf16 %v318_v28  ;;  %v325_v48 = vrot.slane %v320_v38, 7  ;;  %v594_v49 = vunpack.c.l.bf16 %v591_v33  ;;  %v538_v31 = vld [vmem:[%s1794_s20] sm:$0x4]  ;;  %v539_v36 = vld [vmem:[%s1794_s20 + $0x4] sm:$0x4] }
  0x31   : > { %1604 = vrot.lane.b32.xlu0 %v1603_v41, %s1742_s27  ;;  %v530_v51 = vsel %vm256_vm3, %v529_v43, %v523_v27  ;;  %v595_v52 = vunpack.c.l.bf16 %v592_v34  ;;  %v596_v53 = vunpack.c.l.bf16 %v593_v39  ;;  %v387_v54 = vunpack.c.l.bf16 %v384_v40  ;;  %v333_v42 = vld [vmem:[%s1794_s20] sm:$0x2]  ;;  %v334_v43 = vld [vmem:[%s1794_s20 + $0x4] sm:$0x2] }
  0x32   : > { %v532_v57 = vsel %vm275_vm4, %v531_v44, %v530_v51  ;;  %v326_v58 = vsel %vm237_vm2, %v325_v48, %v319_v37  ;;  %v327_v59 = vrot.slane %v321_v47, 6  ;;  %v388_v60 = vunpack.c.l.bf16 %v385_v45  ;;  %v540_v37 = vld [vmem:[%s1794_s20 + $0x8] sm:$0x4]  ;;  %v335_v48 = vld [vmem:[%s1794_s20 + $0x8] sm:$0x2] }
  0x33   : > { %v1608_v63 = vpack.i.bf16 %v532_v57, %v257_v46  ;;  %v600_v0 = vrot.slane %v595_v52, 7  ;;  %v602_v1 = vrot.slane %v596_v53, 6  ;;  %v389_v2 = vunpack.c.l.bf16 %v386_v50  ;;  %v608_v53 = vld [vmem:[%s1794_s20] sm:$0x4] }
  0x34   : > { %v328_v4 = vsel %vm256_vm3, %v327_v59, %v326_v58  ;;  %v393_v5 = vrot.slane %v388_v60, 7  ;;  %v662_v6 = vunpack.c.l.bf16 %v659_v55  ;;  %v663_v7 = vunpack.c.l.bf16 %v660_v56  ;;  %v610_v59 = vld [vmem:[%s1794_s20 + $0x8] sm:$0x4]  ;;  %v401_v60 = vld [vmem:[%s1794_s20] sm:$0x2] }
  0x35   : > { %1609 = vrot.lane.b32.xlu1 %v1608_v63, %s1743_s28  ;;  %v601_v9 = vsel %vm256_vm3, %v600_v0, %v594_v49  ;;  %v395_v10 = vrot.slane %v389_v2, 6  ;;  %v664_v11 = vunpack.c.l.bf16 %v661_v61  ;;  %v455_v12 = vunpack.c.l.bf16 %v452_v62 }
  0x36   : > { %v603_v15 = vsel %vm275_vm4, %v602_v1, %v601_v9  ;;  %v394_v16 = vsel %vm237_vm2, %v393_v5, %v387_v54  ;;  %v668_v17 = vrot.slane %v663_v7, 7  ;;  %v456_v18 = vunpack.c.l.bf16 %v453_v3  ;;  %v609_v54 = vld [vmem:[%s1794_s20 + $0x4] sm:$0x4]  ;;  %v402_v1 = vld [vmem:[%s1794_s20 + $0x4] sm:$0x2] }
  0x37   : > { %v1613_v21 = vpack.i.bf16 %v603_v15, %v328_v4  ;;  %v396_v22 = vsel %vm256_vm3, %v395_v10, %v394_v16  ;;  %v670_v23 = vrot.slane %v664_v11, 6  ;;  %v457_v24 = vunpack.c.l.bf16 %v454_v8  ;;  %v676_v11 = vld [vmem:[%s1794_s20] sm:$0x4] }
  0x38   : > { %v669_v26 = vsel %vm256_vm3, %v668_v17, %v662_v6  ;;  %v461_v27 = vrot.slane %v456_v18, 7  ;;  %v730_v28 = vunpack.c.l.bf16 %v727_v13  ;;  %v731_v29 = vunpack.c.l.bf16 %v728_v14  ;;  %v403_v6 = vld [vmem:[%s1794_s20 + $0x8] sm:$0x2]  ;;  %v678_v17 = vld [vmem:[%s1794_s20 + $0x8] sm:$0x4] }
  0x39   : > { %1614 = vrot.lane.b32.xlu0 %v1613_v21, %s1744_s29  ;;  %v671_v32 = vsel %vm275_vm4, %v670_v23, %v669_v26  ;;  %v463_v33 = vrot.slane %v457_v24, 6  ;;  %v732_v34 = vunpack.c.l.bf16 %v729_v19  ;;  %v266_v35 = vunpack.c.l.bf16 %v263_v20  ;;  %v469_v18 = vld [vmem:[%s1794_s20] sm:$0x2]  ;;  %v470_v23 = vld [vmem:[%s1794_s20 + $0x4] sm:$0x2] }
  0x3a   : > { %v1618_v38 = vpack.i.bf16 %v671_v32, %v396_v22  ;;  %v462_v39 = vsel %vm237_vm2, %v461_v27, %v455_v12  ;;  %v736_v40 = vrot.slane %v731_v29, 7  ;;  %v267_v41 = vunpack.c.l.bf16 %v264_v25  ;;  %v677_v12 = vld [vmem:[%s1794_s20 + $0x4] sm:$0x4] }
  0x3b   : > { %v464_v44 = vsel %vm256_vm3, %v463_v33, %v462_v39  ;;  %v738_v45 = vrot.slane %v732_v34, 6  ;;  %v268_v46 = vunpack.c.l.bf16 %v265_v30  ;;  %v541_v47 = vunpack.c.l.bf16 %v538_v31  ;;  %v744_v33 = vld [vmem:[%s1794_s20] sm:$0x4]  ;;  %v745_v34 = vld [vmem:[%s1794_s20 + $0x4] sm:$0x4] }
  0x3c   : > { %1619 = vrot.lane.b32.xlu1 %v1618_v38, %s1745_s30  ;;  %v737_v49 = vsel %vm256_vm3, %v736_v40, %v730_v28  ;;  %v272_v50 = vrot.slane %v267_v41, 7  ;;  %v542_v51 = vunpack.c.l.bf16 %v539_v36  ;;  %v543_v52 = vunpack.c.l.bf16 %v540_v37  ;;  %v471_v28 = vld [vmem:[%s1794_s20 + $0x8] sm:$0x2]  ;;  %v746_v39 = vld [vmem:[%s1794_s20 + $0x8] sm:$0x4] }
  0x3d   : > { %v739_v55 = vsel %vm275_vm4, %v738_v45, %v737_v49  ;;  %v274_v56 = vrot.slane %v268_v46, 6  ;;  %v336_v57 = vunpack.c.l.bf16 %v333_v42  ;;  %v337_v58 = vunpack.c.l.bf16 %v334_v43  ;;  %v832_v40 = vld [vmem:[%s1794_s20] sm:$0x2]  ;;  %v833_v45 = vld [vmem:[%s1794_s20 + $0x4] sm:$0x2] }
  0x3e   : > { %v1623_v61 = vpack.i.bf16 %v739_v55, %v464_v44  ;;  %v273_v62 = vsel %vm256_vm3, %v272_v50, %v266_v35  ;;  %v547_v63 = vrot.slane %v542_v51, 7  ;;  %v549_v0 = vrot.slane %v543_v52, 6  ;;  %v834_v50 = vld [vmem:[%s1794_s20 + $0x8] sm:$0x2]  ;;  %v1110_v51 = vld [vmem:[%s1794_s20] sm:$0x2] }
  0x3f   : > { %v276_v2 = vsel %vm275_vm4, %v274_v56, %v273_v62  ;;  %v338_v3 = vunpack.c.l.bf16 %v335_v48  ;;  %v342_v4 = vrot.slane %v337_v58, 7  ;;  %v611_v5 = vunpack.c.l.bf16 %v608_v53  ;;  %v1111_v56 = vld [vmem:[%s1794_s20 + $0x4] sm:$0x2]  ;;  %v900_v62 = vld [vmem:[%s1794_s20] sm:$0x2] }
  0x40   : > { %1624 = vrot.lane.b32.xlu0 %v1623_v61, %s1746_s5  ;;  %v548_v7 = vsel %vm275_vm4, %v547_v63, %v541_v47  ;;  %v612_v8 = vunpack.c.l.bf16 %v609_v54  ;;  %v613_v9 = vunpack.c.l.bf16 %v610_v59  ;;  %v404_v10 = vunpack.c.l.bf16 %v401_v60  ;;  %v901_v63 = vld [vmem:[%s1794_s20 + $0x4] sm:$0x2] }
  0x41   : > { %v551_v13 = vsel %vm550_vm5, %v549_v0, %v548_v7  ;;  %v343_v14 = vsel %vm256_vm3, %v342_v4, %v336_v57  ;;  %v344_v15 = vrot.slane %v338_v3, 6  ;;  %v405_v16 = vunpack.c.l.bf16 %v402_v1  ;;  %v1112_v57 = vld [vmem:[%s1794_s20 + $0x8] sm:$0x2] }
  0x42   : > { %v1628_v19 = vpack.i.bf16 %v551_v13, %v276_v2  ;;  %v617_v20 = vrot.slane %v612_v8, 7  ;;  %v619_v21 = vrot.slane %v613_v9, 6  ;;  %v406_v22 = vunpack.c.l.bf16 %v403_v6  ;;  %v902_v4 = vld [vmem:[%s1794_s20 + $0x8] sm:$0x2]  ;;  %v1181_v9 = vld [vmem:[%s1794_s20] sm:$0x2] }
  0x43   : > { %v345_v24 = vsel %vm275_vm4, %v344_v15, %v343_v14  ;;  %v410_v25 = vrot.slane %v405_v16, 7  ;;  %v679_v26 = vunpack.c.l.bf16 %v676_v11  ;;  %v680_v27 = vunpack.c.l.bf16 %v677_v12  ;;  %v1183_v15 = vld [vmem:[%s1794_s20 + $0x8] sm:$0x2]  ;;  %v777_v16 = vld [vmem:[%s1794_s20] sm:$0x2] }
  0x44   : > { %1629 = vrot.lane.b32.xlu1 %v1628_v19, %s1747_s6  ;;  %v618_v29 = vsel %vm275_vm4, %v617_v20, %v611_v5  ;;  %v412_v30 = vrot.slane %v406_v22, 6  ;;  %v681_v31 = vunpack.c.l.bf16 %v678_v17  ;;  %v472_v32 = vunpack.c.l.bf16 %v469_v18 }
  0x45   : > { %v620_v35 = vsel %vm550_vm5, %v619_v21, %v618_v29  ;;  %v411_v36 = vsel %vm256_vm3, %v410_v25, %v404_v10  ;;  %v685_v37 = vrot.slane %v680_v27, 7  ;;  %v473_v38 = vunpack.c.l.bf16 %v470_v23  ;;  %v1182_v10 = vld [vmem:[%s1794_s20 + $0x4] sm:$0x2] }
  0x46   : > { %v1633_v41 = vpack.i.bf16 %v620_v35, %v345_v24  ;;  %v413_v42 = vsel %vm275_vm4, %v412_v30, %v411_v36  ;;  %v687_v43 = vrot.slane %v681_v31, 6  ;;  %v474_v44 = vunpack.c.l.bf16 %v471_v28  ;;  %v778_v21 = vld [vmem:[%s1794_s20 + $0x4] sm:$0x2]  ;;  %v1052_v31 = vld [vmem:[%s1794_s20] sm:$0x4] }
  0x47   : > { %v686_v46 = vsel %vm275_vm4, %v685_v37, %v679_v26  ;;  %v478_v47 = vrot.slane %v473_v38, 7  ;;  %v747_v48 = vunpack.c.l.bf16 %v744_v33  ;;  %v748_v49 = vunpack.c.l.bf16 %v745_v34  ;;  %v779_v26 = vld [vmem:[%s1794_s20 + $0x8] sm:$0x2]  ;;  %v1054_v37 = vld [vmem:[%s1794_s20 + $0x8] sm:$0x4] }
  0x48   : > { %1634 = vrot.lane.b32.xlu0 %v1633_v41, %s1748_s7  ;;  %v688_v52 = vsel %vm550_vm5, %v687_v43, %v686_v46  ;;  %v480_v53 = vrot.slane %v474_v44, 6  ;;  %v749_v54 = vunpack.c.l.bf16 %v746_v39  ;;  %v835_v55 = vunpack.c.l.bf16 %v832_v40  ;;  %v849_v38 = vld [vmem:[%s1794_s20] sm:$0x2]  ;;  %v850_v43 = vld [vmem:[%s1794_s20 + $0x4] sm:$0x2] }
  0x49   : > { %v1638_v58 = vpack.i.bf16 %v688_v52, %v413_v42  ;;  %v479_v59 = vsel %vm256_vm3, %v478_v47, %v472_v32  ;;  %v753_v60 = vrot.slane %v748_v49, 7  ;;  %v836_v61 = vunpack.c.l.bf16 %v833_v45  ;;  %v1053_v32 = vld [vmem:[%s1794_s20 + $0x4] sm:$0x4] }
  0x4a   : > { %v481_v0 = vsel %vm275_vm4, %v480_v53, %v479_v59  ;;  %v755_v1 = vrot.slane %v749_v54, 6  ;;  %v837_v2 = vunpack.c.l.bf16 %v834_v50  ;;  %v1113_v3 = vunpack.c.l.bf16 %v1110_v51  ;;  %v1127_v53 = vld [vmem:[%s1794_s20] sm:$0x4]  ;;  %v1128_v54 = vld [vmem:[%s1794_s20 + $0x4] sm:$0x4] }
  0x4b   : > { %1639 = vrot.lane.b32.xlu1 %v1638_v58, %s1749_s8  ;;  %v754_v5 = vsel %vm275_vm4, %v753_v60, %v747_v48  ;;  %v841_v6 = vrot.slane %v836_v61, 7  ;;  %v1114_v7 = vunpack.c.l.bf16 %v1111_v56  ;;  %v1115_v8 = vunpack.c.l.bf16 %v1112_v57  ;;  %v851_v48 = vld [vmem:[%s1794_s20 + $0x8] sm:$0x2]  ;;  %v1129_v59 = vld [vmem:[%s1794_s20 + $0x8] sm:$0x4] }
  0x4c   : > { %v756_v11 = vsel %vm550_vm5, %v755_v1, %v754_v5  ;;  %v843_v12 = vrot.slane %v837_v2, 6  ;;  %v903_v13 = vunpack.c.l.bf16 %v900_v62  ;;  %v904_v14 = vunpack.c.l.bf16 %v901_v63  ;;  %v917_v60 = vld [vmem:[%s1794_s20] sm:$0x2]  ;;  %v918_v1 = vld [vmem:[%s1794_s20 + $0x4] sm:$0x2] }
  0x4d   : > { %v1643_v17 = vpack.i.bf16 %v756_v11, %v481_v0  ;;  %v842_v18 = vsel %vm237_vm2, %v841_v6, %v835_v55  ;;  %v1119_v19 = vrot.slane %v1114_v7, 7  ;;  %v1121_v20 = vrot.slane %v1115_v8, 6  ;;  %v919_v6 = vld [vmem:[%s1794_s20 + $0x8] sm:$0x2]  ;;  %v1198_v7 = vld [vmem:[%s1794_s20] sm:$0x4] }
  0x4e   : > { %v844_v22 = vsel %vm256_vm3, %v843_v12, %v842_v18  ;;  %v905_v23 = vunpack.c.l.bf16 %v902_v4  ;;  %v909_v24 = vrot.slane %v904_v14, 7  ;;  %v1184_v25 = vunpack.c.l.bf16 %v1181_v9  ;;  %v1199_v12 = vld [vmem:[%s1794_s20 + $0x4] sm:$0x4]  ;;  %v795_v18 = vld [vmem:[%s1794_s20] sm:$0x4] }
  0x4f   : > { %1644 = vrot.lane.b32.xlu0 %v1643_v17, %s1750_s9  ;;  %v1120_v27 = vsel %vm256_vm3, %v1119_v19, %v1113_v3  ;;  %v1185_v28 = vunpack.c.l.bf16 %v1182_v10  ;;  %v1186_v29 = vunpack.c.l.bf16 %v1183_v15  ;;  %v780_v30 = vunpack.c.l.bf16 %v777_v16  ;;  %v796_v19 = vld [vmem:[%s1794_s20 + $0x4] sm:$0x4] }
  0x50   : > { %v1122_v33 = vsel %vm275_vm4, %v1121_v20, %v1120_v27  ;;  %v910_v34 = vsel %vm237_vm2, %v909_v24, %v903_v13  ;;  %v911_v35 = vrot.slane %v905_v23, 6  ;;  %v781_v36 = vunpack.c.l.bf16 %v778_v21  ;;  %v1200_v13 = vld [vmem:[%s1794_s20 + $0x8] sm:$0x4] }
  0x51   : > { %v1648_v39 = vpack.i.bf16 %v1122_v33, %v844_v22  ;;  %v1190_v40 = vrot.slane %v1185_v28, 7  ;;  %v1192_v41 = vrot.slane %v1186_v29, 6  ;;  %v782_v42 = vunpack.c.l.bf16 %v779_v26  ;;  %v797_v24 = vld [vmem:[%s1794_s20 + $0x8] sm:$0x4]  ;;  %v1070_v29 = vld [vmem:[%s1794_s20] sm:$0x4] }
  0x52   : > { %v912_v44 = vsel %vm256_vm3, %v911_v35, %v910_v34  ;;  %v786_v45 = vrot.slane %v781_v36, 7  ;;  %v1055_v46 = vunpack.c.l.bf16 %v1052_v31  ;;  %v1056_v47 = vunpack.c.l.bf16 %v1053_v32  ;;  %v1072_v35 = vld [vmem:[%s1794_s20 + $0x8] sm:$0x4]  ;;  %v866_v36 = vld [vmem:[%s1794_s20] sm:$0x4] }
  0x53   : > { %1649 = vrot.lane.b32.xlu1 %v1648_v39, %s1737_s22  ;;  %v1191_v49 = vsel %vm256_vm3, %v1190_v40, %v1184_v25  ;;  %v788_v50 = vrot.slane %v782_v42, 6  ;;  %v1057_v51 = vunpack.c.l.bf16 %v1054_v37  ;;  %v852_v52 = vunpack.c.l.bf16 %v849_v38  ;;  %s202_s22 = scalar_lea.vmem %s2236_s3, %s1509_s14 }
  0x54   : > { %v1193_v55 = vsel %vm275_vm4, %v1192_v41, %v1191_v49  ;;  %v787_v56 = vsel %vm256_vm3, %v786_v45, %v780_v30  ;;  %v1061_v57 = vrot.slane %v1056_v47, 7  ;;  %v853_v58 = vunpack.c.l.bf16 %v850_v43  ;;  %v1071_v30 = vld [vmem:[%s1794_s20 + $0x4] sm:$0x4] }
  0x55   : > { %v1653_v61 = vpack.i.bf16 %v1193_v55, %v912_v44  ;;  %v789_v62 = vsel %vm275_vm4, %v788_v50, %v787_v56  ;;  %v1063_v63 = vrot.slane %v1057_v51, 6  ;;  %v854_v0 = vunpack.c.l.bf16 %v851_v48  ;;  %v867_v41 = vld [vmem:[%s1794_s20 + $0x4] sm:$0x4]  ;;  %v1144_v51 = vld [vmem:[%s1794_s20] sm:$0x4] }
  0x56   : > { %v1062_v2 = vsel %vm275_vm4, %v1061_v57, %v1055_v46  ;;  %v858_v3 = vrot.slane %v853_v58, 7  ;;  %v1130_v4 = vunpack.c.l.bf16 %v1127_v53  ;;  %v1131_v5 = vunpack.c.l.bf16 %v1128_v54  ;;  %v868_v46 = vld [vmem:[%s1794_s20 + $0x8] sm:$0x4]  ;;  %v934_v58 = vld [vmem:[%s1794_s20] sm:$0x4] }
  0x57   : > { %1654 = vrot.lane.b32.xlu0 %v1653_v61, %s1738_s23  ;;  %v1064_v8 = vsel %vm550_vm5, %v1063_v63, %v1062_v2  ;;  %v860_v9 = vrot.slane %v854_v0, 6  ;;  %v1132_v10 = vunpack.c.l.bf16 %v1129_v59  ;;  %v920_v11 = vunpack.c.l.bf16 %v917_v60  ;;  %v1146_v57 = vld [vmem:[%s1794_s20 + $0x8] sm:$0x4]  ;;  %v935_v63 = vld [vmem:[%s1794_s20 + $0x4] sm:$0x4] }
  0x58   : > { %v1658_v14 = vpack.i.bf16 %v1064_v8, %v789_v62  ;;  %v859_v15 = vsel %vm256_vm3, %v858_v3, %v852_v52  ;;  %v1136_v16 = vrot.slane %v1131_v5, 7  ;;  %v921_v17 = vunpack.c.l.bf16 %v918_v1  ;;  %v1145_v52 = vld [vmem:[%s1794_s20 + $0x4] sm:$0x4] }
  0x59   : > { %v861_v20 = vsel %vm275_vm4, %v860_v9, %v859_v15  ;;  %v1138_v21 = vrot.slane %v1132_v10, 6  ;;  %v922_v22 = vunpack.c.l.bf16 %v919_v6  ;;  %v1201_v23 = vunpack.c.l.bf16 %v1198_v7  ;;  %v1215_v9 = vld [vmem:[%s1794_s20] sm:$0x4]  ;;  %v1216_v10 = vld [vmem:[%s1794_s20 + $0x4] sm:$0x4] }
  0x5a   : > { %1659 = vrot.lane.b32.xlu1 %v1658_v14, %s1739_s24  ;;  %v1137_v25 = vsel %vm275_vm4, %v1136_v16, %v1130_v4  ;;  %v926_v26 = vrot.slane %v921_v17, 7  ;;  %v1202_v27 = vunpack.c.l.bf16 %v1199_v12  ;;  %v1203_v28 = vunpack.c.l.bf16 %v1200_v13  ;;  %v936_v4 = vld [vmem:[%s1794_s20 + $0x8] sm:$0x4]  ;;  %v813_v16 = vld [vmem:[%s1794_s20] sm:$0x4] }
  0x5b   : > { %v1139_v31 = vsel %vm550_vm5, %v1138_v21, %v1137_v25  ;;  %v928_v32 = vrot.slane %v922_v22, 6  ;;  %v798_v33 = vunpack.c.l.bf16 %v795_v18  ;;  %v799_v34 = vunpack.c.l.bf16 %v796_v19  ;;  %v1217_v15 = vld [vmem:[%s1794_s20 + $0x8] sm:$0x4]  ;;  %v814_v21 = vld [vmem:[%s1794_s20 + $0x4] sm:$0x4] }
  0x5c   : > { %v1663_v37 = vpack.i.bf16 %v1139_v31, %v861_v20  ;;  %v927_v38 = vsel %vm256_vm3, %v926_v26, %v920_v11  ;;  %v1207_v39 = vrot.slane %v1202_v27, 7  ;;  %v1209_v40 = vrot.slane %v1203_v28, 6  ;;  %v815_v26 = vld [vmem:[%s1794_s20 + $0x8] sm:$0x4]  ;;  %v1088_v27 = vld [vmem:[%s1794_s20] sm:$0x8] }
  0x5d   : > { %v929_v42 = vsel %vm275_vm4, %v928_v32, %v927_v38  ;;  %v800_v43 = vunpack.c.l.bf16 %v797_v24  ;;  %v804_v44 = vrot.slane %v799_v34, 7  ;;  %v1073_v45 = vunpack.c.l.bf16 %v1070_v29  ;;  %v1089_v32 = vld [vmem:[%s1794_s20 + $0x4] sm:$0x8]  ;;  %v884_v38 = vld [vmem:[%s1794_s20 + $0x4] sm:$0x4] }
  0x5e   : > { %1664 = vrot.lane.b32.xlu0 %v1663_v37, %s1740_s25  ;;  %v1208_v47 = vsel %vm275_vm4, %v1207_v39, %v1201_v23  ;;  %v1074_v48 = vunpack.c.l.bf16 %v1071_v30  ;;  %v1075_v49 = vunpack.c.l.bf16 %v1072_v35  ;;  %v869_v50 = vunpack.c.l.bf16 %v866_v36  ;;  %v885_v39 = vld [vmem:[%s1794_s20 + $0x8] sm:$0x4] }
  0x5f   : > { %v1210_v53 = vsel %vm550_vm5, %v1209_v40, %v1208_v47  ;;  %v805_v54 = vsel %vm275_vm4, %v804_v44, %v798_v33  ;;  %v806_v55 = vrot.slane %v800_v43, 6  ;;  %v870_v56 = vunpack.c.l.bf16 %v867_v41  ;;  %v883_v33 = vld [vmem:[%s1794_s20] sm:$0x4]  ;;  %v1161_v44 = vld [vmem:[%s1794_s20] sm:$0x8] }
  0x60   : > { %v1668_v59 = vpack.i.bf16 %v1210_v53, %v929_v42  ;;  %v1079_v60 = vrot.slane %v1074_v48, 7  ;;  %v1081_v61 = vrot.slane %v1075_v49, 6  ;;  %v871_v62 = vunpack.c.l.bf16 %v868_v46  ;;  %v1162_v49 = vld [vmem:[%s1794_s20 + $0x4] sm:$0x8] }
  0x61   : > { %v807_v0 = vsel %vm550_vm5, %v806_v55, %v805_v54  ;;  %v875_v1 = vrot.slane %v870_v56, 7  ;;  %v1147_v2 = vunpack.c.l.bf16 %v1144_v51  ;;  %v1148_v3 = vunpack.c.l.bf16 %v1145_v52  ;;  %v952_v55 = vld [vmem:[%s1794_s20 + $0x4] sm:$0x4]  ;;  %v953_v56 = vld [vmem:[%s1794_s20 + $0x8] sm:$0x4] }
  0x62   : > { %1669 = vrot.lane.b32.xlu1 %v1668_v59, %s1741_s26  ;;  %v1080_v5 = vsel %vm550_vm5, %v1079_v60, %v1073_v45  ;;  %v877_v6 = vrot.slane %v871_v62, 6  ;;  %v1149_v7 = vunpack.c.l.bf16 %v1146_v57  ;;  %v937_v8 = vunpack.c.l.bf16 %v934_v58 }
  0x63   : > { %v1082_v11 = vsel %vm825_vm6, %v1081_v61, %v1080_v5  ;;  %v876_v12 = vsel %vm275_vm4, %v875_v1, %v869_v50  ;;  %v1153_v13 = vrot.slane %v1148_v3, 7  ;;  %v938_v14 = vunpack.c.l.bf16 %v935_v63  ;;  %v951_v50 = vld [vmem:[%s1794_s20] sm:$0x4]  ;;  %v1232_v61 = vld [vmem:[%s1794_s20] sm:$0x8] }
  0x64   : > { %v1673_v17 = vpack.i.bf16 %v1082_v11, %v807_v0  ;;  %v878_v18 = vsel %vm550_vm5, %v877_v6, %v876_v12  ;;  %v1155_v19 = vrot.slane %v1149_v7, 6  ;;  %v939_v20 = vunpack.c.l.bf16 %v936_v4  ;;  %v968_v7 = vld [vmem:[%s1794_s20] sm:$0x2] }
  0x65   : > { %v1154_v22 = vsel %vm550_vm5, %v1153_v13, %v1147_v2  ;;  %v943_v23 = vrot.slane %v938_v14, 7  ;;  %v1218_v24 = vunpack.c.l.bf16 %v1215_v9  ;;  %v1219_v25 = vunpack.c.l.bf16 %v1216_v10  ;;  %v1233_v2 = vld [vmem:[%s1794_s20 + $0x4] sm:$0x8]  ;;  %v970_v9 = vld [vmem:[%s1794_s20 + $0x8] sm:$0x2] }
  0x66   : > { %1674 = vrot.lane.b32.xlu0 %v1673_v17, %s1743_s28  ;;  %v1156_v28 = vsel %vm825_vm6, %v1155_v19, %v1154_v22  ;;  %v945_v29 = vrot.slane %v939_v20, 6  ;;  %v1220_v30 = vunpack.c.l.bf16 %v1217_v15  ;;  %v816_v31 = vunpack.c.l.bf16 %v813_v16  ;;  %v1252_v14 = vld [vmem:[%s1794_s20] sm:$0x2]  ;;  %v1253_v19 = vld [vmem:[%s1794_s20 + $0x4] sm:$0x2] }
  0x67   : > { %v1678_v34 = vpack.i.bf16 %v1156_v28, %v878_v18  ;;  %v944_v35 = vsel %vm275_vm4, %v943_v23, %v937_v8  ;;  %v1224_v36 = vrot.slane %v1219_v25, 7  ;;  %v817_v37 = vunpack.c.l.bf16 %v814_v21  ;;  %v969_v8 = vld [vmem:[%s1794_s20 + $0x4] sm:$0x2]  ;;  %v985_v25 = vld [vmem:[%s1794_s20] sm:$0x2] }
  0x68   : > { %v946_v40 = vsel %vm550_vm5, %v945_v29, %v944_v35  ;;  %v1226_v41 = vrot.slane %v1220_v30, 6  ;;  %v818_v42 = vunpack.c.l.bf16 %v815_v26  ;;  %v1091_v43 = vunpack.c.l.bf16 %v1088_v27  ;;  %v986_v26 = vld [vmem:[%s1794_s20 + $0x4] sm:$0x2] }
  0x69   : > { %1679 = vrot.lane.b32.xlu1 %v1678_v34, %s1744_s29  ;;  %v1225_v45 = vsel %vm550_vm5, %v1224_v36, %v1218_v24  ;;  %v822_v46 = vrot.slane %v817_v37, 7  ;;  %v1092_v47 = vunpack.c.l.bf16 %v1089_v32  ;;  %v886_v48 = vunpack.c.l.bf16 %v883_v33  ;;  %v1254_v24 = vld [vmem:[%s1794_s20 + $0x8] sm:$0x2]  ;;  %v1269_v36 = vld [vmem:[%s1794_s20] sm:$0x4] }
  0x6a   : > { %v1227_v51 = vsel %vm825_vm6, %v1226_v41, %v1225_v45  ;;  %v824_v52 = vrot.slane %v818_v42, 6  ;;  %v887_v53 = vunpack.c.l.bf16 %v884_v38  ;;  %v888_v54 = vunpack.c.l.bf16 %v885_v39  ;;  %v1270_v41 = vld [vmem:[%s1794_s20 + $0x4] sm:$0x4]  ;;  %v1271_v42 = vld [vmem:[%s1794_s20 + $0x8] sm:$0x4] }
  0x6b   : > { %v1683_v57 = vpack.i.bf16 %v1227_v51, %v946_v40  ;;  %v823_v58 = vsel %vm550_vm5, %v822_v46, %v816_v31  ;;  %v1097_v59 = vrot.slane %v1092_v47, 7  ;;  %v1164_v60 = vunpack.c.l.bf16 %v1161_v44  ;;  %v987_v31 = vld [vmem:[%s1794_s20 + $0x8] sm:$0x2]  ;;  %v1002_v47 = vld [vmem:[%s1794_s20] sm:$0x4] }
  0x6c   : > { %v826_v62 = vsel %vm825_vm6, %v824_v52, %v823_v58  ;;  %v892_v63 = vrot.slane %v887_v53, 7  ;;  %v894_v0 = vrot.slane %v888_v54, 6  ;;  %v1165_v1 = vunpack.c.l.bf16 %v1162_v49  ;;  %v1004_v53 = vld [vmem:[%s1794_s20 + $0x8] sm:$0x4]  ;;  %v1286_v58 = vld [vmem:[%s1794_s20] sm:$0x4] }
  0x6d   : > { %1684 = vrot.lane.b32.xlu0 %v1683_v57, %s1745_s30  ;;  %v1098_v3 = vsel %vm825_vm6, %v1097_v59, %v1091_v43  ;;  %v954_v4 = vunpack.c.l.bf16 %v951_v50  ;;  %v955_v5 = vunpack.c.l.bf16 %v952_v55  ;;  %v956_v6 = vunpack.c.l.bf16 %v953_v56  ;;  %v1287_v59 = vld [vmem:[%s1794_s20 + $0x4] sm:$0x4] }
  0x6e   : > { %v1688_v10 = vpack.i.bf16 %v1098_v3, %v826_v62  ;;  %v893_v11 = vsel %vm550_vm5, %v892_v63, %v886_v48  ;;  %v1170_v12 = vrot.slane %v1165_v1, 7  ;;  %v1235_v13 = vunpack.c.l.bf16 %v1232_v61  ;;  %v1003_v48 = vld [vmem:[%s1794_s20 + $0x4] sm:$0x4]  ;;  %v1019_v1 = vld [vmem:[%s1794_s20] sm:$0x4] }
  0x6f   : > { %v895_v15 = vsel %vm825_vm6, %v894_v0, %v893_v11  ;;  %v960_v16 = vrot.slane %v955_v5, 7  ;;  %v962_v17 = vrot.slane %v956_v6, 6  ;;  %v1236_v18 = vunpack.c.l.bf16 %v1233_v2  ;;  %v1288_v0 = vld [vmem:[%s1794_s20 + $0x8] sm:$0x4]  ;;  %v1020_v2 = vld [vmem:[%s1794_s20 + $0x4] sm:$0x4] }
  0x70   : > { %1689 = vrot.lane.b32.xlu1 %v1688_v10, %s1747_s6  ;;  %v1171_v20 = vsel %vm825_vm6, %v1170_v12, %v1164_v60  ;;  %v971_v21 = vunpack.c.l.bf16 %v968_v7  ;;  %v972_v22 = vunpack.c.l.bf16 %v969_v8  ;;  %v973_v23 = vunpack.c.l.bf16 %v970_v9  ;;  %v1021_v11 = vld [vmem:[%s1794_s20 + $0x8] sm:$0x4] }
  0x71   : > { %v1693_v27 = vpack.i.bf16 %v1171_v20, %v895_v15  ;;  %v961_v28 = vsel %vm550_vm5, %v960_v16, %v954_v4  ;;  %v1241_v29 = vrot.slane %v1236_v18, 7  ;;  %v1255_v30 = vunpack.c.l.bf16 %v1252_v14  ;;  %v1303_v16 = vld [vmem:[%s1794_s20] sm:$0x8] }
  0x72   : > { %v963_v32 = vsel %vm825_vm6, %v962_v17, %v961_v28  ;;  %v977_v33 = vrot.slane %v972_v22, 7  ;;  %v979_v34 = vrot.slane %v973_v23, 6  ;;  %v1256_v35 = vunpack.c.l.bf16 %v1253_v19  ;;  %v1304_v17 = vld [vmem:[%s1794_s20 + $0x4] sm:$0x8]  ;;  %v1090_v22 = vld [vmem:[%s1794_s20 + $0x8] sm:$0x8] }
  0x73   : > { %1694 = vrot.lane.b32.xlu0 %v1693_v27, %s1748_s7  ;;  %v1242_v37 = vsel %vm825_vm6, %v1241_v29, %v1235_v13  ;;  %v1257_v38 = vunpack.c.l.bf16 %v1254_v24  ;;  %v988_v39 = vunpack.c.l.bf16 %v985_v25  ;;  %v989_v40 = vunpack.c.l.bf16 %v986_v26 }
  0x74   : > { %v1698_v43 = vpack.i.bf16 %v1242_v37, %v963_v32  ;;  %v978_v44 = vsel %vm237_vm2, %v977_v33, %v971_v21  ;;  %v1261_v45 = vrot.slane %v1256_v35, 7  ;;  %v990_v46 = vunpack.c.l.bf16 %v987_v31  ;;  %v1163_v31 = vld [vmem:[%s1794_s20 + $0x8] sm:$0x8]  ;;  %v486_v37 = vld [vmem:[%s1794_s20] sm:$0x1] }
  0x75   : > { %v980_v49 = vsel %vm256_vm3, %v979_v34, %v978_v44  ;;  %v1263_v50 = vrot.slane %v1257_v38, 6  ;;  %v994_v51 = vrot.slane %v989_v40, 7  ;;  %v1272_v52 = vunpack.c.l.bf16 %v1269_v36  ;;  %v1234_v36 = vld [vmem:[%s1794_s20 + $0x8] sm:$0x8]  ;;  %v487_v40 = vld [vmem:[%s1794_s20 + $0x4] sm:$0x1] }
  0x76   : > { %1699 = vrot.lane.b32.xlu1 %v1698_v43, %s1749_s8  ;;  %v1262_v54 = vsel %vm256_vm3, %v1261_v45, %v1255_v30  ;;  %v996_v55 = vrot.slane %v990_v46, 6  ;;  %v1273_v56 = vunpack.c.l.bf16 %v1270_v41  ;;  %v1274_v57 = vunpack.c.l.bf16 %v1271_v42  ;;  %v488_v41 = vld [vmem:[%s1794_s20 + $0x8] sm:$0x1]  ;;  %v207_v44 = vld [vmem:[%s1794_s20] sm:$0x1] }
  0x77   : > { %v1264_v60 = vsel %vm275_vm4, %v1263_v50, %v1262_v54  ;;  %v995_v61 = vsel %vm256_vm3, %v994_v51, %v988_v39  ;;  %v1005_v62 = vunpack.c.l.bf16 %v1002_v47  ;;  %v1006_v63 = vunpack.c.l.bf16 %v1003_v48  ;;  %v208_v45 = vld [vmem:[%s1794_s20 + $0x4] sm:$0x1]  ;;  %v209_v46 = vld [vmem:[%s1794_s20 + $0x8] sm:$0x1]  ;;  %v1305_v50 = vld [vmem:[%s1794_s20 + $0x8] sm:$0x8] }
  0x78   : > { %v1703_v3 = vpack.i.bf16 %v1264_v60, %v980_v49  ;;  %v997_v4 = vsel %vm275_vm4, %v996_v55, %v995_v61  ;;  %v1278_v5 = vrot.slane %v1273_v56, 7  ;;  %v1280_v6 = vrot.slane %v1274_v57, 6 }
  0x79   : > { %v1007_v7 = vunpack.c.l.bf16 %v1004_v53  ;;  %v1011_v8 = vrot.slane %v1006_v63, 7  ;;  %v1289_v9 = vunpack.c.l.bf16 %v1286_v58  ;;  %v1290_v10 = vunpack.c.l.bf16 %v1287_v59  ;;  %v761_v58 = vld [vmem:[%s1794_s20] sm:$0x2]  ;;  %v762_v59 = vld [vmem:[%s1794_s20 + $0x4] sm:$0x2] }
  0x7a   : > { %1704 = vrot.lane.b32.xlu0 %v1703_v3, %s1736_s21  ;;  %v1279_v12 = vsel %vm275_vm4, %v1278_v5, %v1272_v52  ;;  %v1291_v13 = vunpack.c.l.bf16 %v1288_v0  ;;  %v1022_v14 = vunpack.c.l.bf16 %v1019_v1  ;;  %v1023_v15 = vunpack.c.l.bf16 %v1020_v2  ;;  %v763_v0 = vld [vmem:[%s1794_s20 + $0x8] sm:$0x2] }
  0x7b   : > { %v1281_v18 = vsel %vm550_vm5, %v1280_v6, %v1279_v12  ;;  %v1012_v19 = vsel %vm275_vm4, %v1011_v8, %v1005_v62  ;;  %v1013_v20 = vrot.slane %v1007_v7, 6  ;;  %v1295_v21 = vrot.slane %v1290_v10, 7  ;;  %v1036_v10 = vld [vmem:[%s1794_s20] sm:$0x2]  ;;  %v1038_v12 = vld [vmem:[%s1794_s20 + $0x8] sm:$0x2] }
  0x7c   : > { %v1708_v23 = vpack.i.bf16 %v1281_v18, %v997_v4  ;;  %v1297_v24 = vrot.slane %v1291_v13, 6  ;;  %v1024_v25 = vunpack.c.l.bf16 %v1021_v11  ;;  %v1028_v26 = vrot.slane %v1023_v15, 7  ;;  %v1037_v11 = vld [vmem:[%s1794_s20 + $0x4] sm:$0x2] }
  0x7d   : > { %v1014_v27 = vsel %vm550_vm5, %v1013_v20, %v1012_v19  ;;  %v1296_v28 = vsel %vm550_vm5, %v1295_v21, %v1289_v9  ;;  %v1306_v29 = vunpack.c.l.bf16 %v1303_v16  ;;  %v1307_v30 = vunpack.c.l.bf16 %v1304_v17 }
  0x7e   : > { %1709 = vrot.lane.b32.xlu1 %v1708_v23, %s1742_s27  ;;  %v1298_v32 = vsel %vm825_vm6, %v1297_v24, %v1296_v28  ;;  %v1029_v33 = vsel %vm550_vm5, %v1028_v26, %v1022_v14  ;;  %v1030_v34 = vrot.slane %v1024_v25, 6  ;;  %v1093_v35 = vunpack.c.l.bf16 %v1090_v22  ;;  %v1330_v25 = vld [vmem:[%s2235_s2] sm:$0xff] }
  0x7f   : > { %v1713_v38 = vpack.i.bf16 %v1298_v32, %v1014_v27  ;;  %v1312_v39 = vrot.slane %v1307_v30, 7  ;;  %v1166_v43 = vunpack.c.l.bf16 %v1163_v31  ;;  %v1237_v49 = vunpack.c.l.bf16 %v1234_v36 }
  0x80   : > { %v1031_v42 = vsel %vm825_vm6, %v1030_v34, %v1029_v33  ;;  %v1099_v48 = vrot.slane %v1093_v35, 6  ;;  %v489_v52 = vunpack.c.l.bf16 %v486_v37  ;;  %v490_v53 = vunpack.c.l.bf16 %v487_v40 }
  0x81   : > { %1714 = vrot.lane.b32.xlu0 %v1713_v38, %s1746_s5  ;;  %v1313_v47 = vsel %vm825_vm6, %v1312_v39, %v1306_v29  ;;  %v491_v54 = vunpack.c.l.bf16 %v488_v41  ;;  %v210_v55 = vunpack.c.l.bf16 %v207_v44  ;;  %v211_v56 = vunpack.c.l.bf16 %v208_v45 }
  0x82   : > { %v1718_v51 = vpack.i.bf16 %v1313_v47, %v1031_v42  ;;  %v212_v57 = vunpack.c.l.bf16 %v209_v46  ;;  %v1172_v60 = vrot.slane %v1166_v43, 6  ;;  %v1308_v61 = vunpack.c.l.bf16 %v1305_v50 }
  0x83   : > { %v495_v62 = vrot.slane %v490_v53, 7  ;;  %v497_v63 = vrot.slane %v491_v54, 6  ;;  %v1243_v1 = vrot.slane %v1237_v49, 6  ;;  %v216_v2 = vrot.slane %v211_v56, 7 }
  0x84   : > { %1719 = vrot.lane.b32.xlu1 %v1718_v51, %s1750_s9  ;;  %v219_v3 = vrot.slane %v212_v57, 6  ;;  %v764_v5 = vunpack.c.l.bf16 %v761_v58  ;;  %v765_v8 = vunpack.c.l.bf16 %v762_v59  ;;  %v766_v9 = vunpack.c.l.bf16 %v763_v0 }
  0x85   : > { %1102 = vrot.lane.b32.xlu0 %v1099_v48, %s1747_s6  ;;  %v496_v4 = vsel %vm220_vm1, %v495_v62, %v489_v52  ;;  %v218_v7 = vsel %vm217_vm0, %v216_v2, %v210_v55  ;;  %v1314_v13 = vrot.slane %v1308_v61, 6  ;;  %v1751_v17 = vmov 0.0|0.0  }
  0x86   : > { %v498_v6 = vsel %vm237_vm2, %v497_v63, %v496_v4  ;;  %v221_v14 = vsel %vm220_vm1, %v219_v3, %v218_v7  ;;  %v770_v15 = vrot.slane %v765_v8, 7  ;;  %v772_v16 = vrot.slane %v766_v9, 6  ;;  %1536 = vmatprep.subr.bf16.mxu0 %v1751_v17 }
  0x87   : > { %501 = vst.msk [vmem:[#allocation2 + $0xb] sm:$0xe] %vm500_vm7, %v498_v6  ;;  %v1039_v18 = vunpack.c.l.bf16 %v1036_v10  ;;  %v1040_v19 = vunpack.c.l.bf16 %v1037_v11  ;;  %v1041_v20 = vunpack.c.l.bf16 %v1038_v12  ;;  %v1753_v27 = vmov 0.0  }
  0x88   : > { %1175 = vrot.lane.b32.xlu1 %v1172_v60, %s1748_s7  ;;  %224 = vst.msk [vmem:[#allocation2] sm:$0x7] %vm223_vm8, %v221_v14  ;;  %v771_v21 = vsel %vm237_vm2, %v770_v15, %v764_v5  ;;  %1533 = vmatprep.mubr.msk.f32.mxu0 %vm1752_vm10, %v1753_v27  ;;  %v1754_v31 = vmov 0   ;;  %vm280_vm0 = vcmask 128099   ;;  %vm555_vm1 = vcmask 129124  }
  0x89   : > { %1246 = vrot.lane.b32.xlu0 %v1243_v1, %s1749_s8  ;;  %v773_v22 = vsel %vm256_vm3, %v772_v16, %v771_v21  ;;  %v1045_v23 = vrot.slane %v1040_v19, 7  ;;  %v1047_v24 = vrot.slane %v1041_v20, 6  ;;  %vm793_vm2 = vcmask 62499  }
  0x8a   : > { %776 = vst.msk [vmem:[#allocation2 + $0x16] sm:$0x1c] %vm775_vm9, %v773_v22  ;;  %1723 = vset.pattern.permute.xlu0 %v1754_v31  ;;  %vm1086_vm5 = vcmask 97349   ;;  %vm830_vm6 = vcmask 130149   ;;  %vm1415_vm10 = vcmask 130048  }
  0x8b   : > { %v1046_v30 = vsel %vm256_vm3, %v1045_v23, %v1039_v18  ;;  %vm1068_vm3 = vcmask 63524  }
  0x8c   : > { %1317 = vrot.lane.b32.xlu1 %v1314_v13, %s1750_s9  ;;  %v1048_v32 = vsel %vm275_vm4, %v1047_v24, %v1046_v30  ;;  %vm811_vm4 = vcmask 96324  }
  0x8d   : > { %v1585_v26 = vpop.permute.xlu1 %1584  ;;  %1333 = vperm.xlu0 %1723, %v1330_v25   ;;  %1051 = vst.msk [vmem:[#allocation2 + $0x21] sm:$0x38] %vm1050_vm11, %v1048_v32 }
  0x8e   : > { %v1587_v28 = vunpack.i.h.bf16 %v1585_v26  ;;  %v1586_v29 = vunpack.i.l.bf16 %v1585_v26 }
  0x90   : > { %709 = vst.msk [vmem:[#allocation2 + $0x14] sm:$0xe] %vm500_vm7, %v1587_v28  ;;  %v1575_v33 = vpop.permute.xlu0 %1574 }
  0x91   : > { %434 = vst.msk [vmem:[#allocation2 + $0x9] sm:$0x7] %vm223_vm8, %v1586_v29  ;;  %v1577_v34 = vunpack.i.h.bf16 %v1575_v33  ;;  %v1576_v35 = vunpack.i.l.bf16 %v1575_v33 }
  0x93   : > { %573 = vst.msk [vmem:[#allocation2 + $0xe] sm:$0xe] %vm500_vm7, %v1577_v34 }
  0x94   : > { %298 = vst.msk [vmem:[#allocation2 + $0x3] sm:$0x7] %vm223_vm8, %v1576_v35  ;;  %v1580_v36 = vpop.permute.xlu0 %1579 }
  0x95   : > { %v1582_v37 = vunpack.i.h.bf16 %v1580_v36  ;;  %v1581_v38 = vunpack.i.l.bf16 %v1580_v36 }
  0x97   : > { %641 = vst.msk [vmem:[#allocation2 + $0x11] sm:$0xe] %vm500_vm7, %v1582_v37  ;;  %v1590_v39 = vpop.permute.xlu1 %1589  ;;  %vm1106_vm7 = vcmask 130150  }
  0x98   : > { %366 = vst.msk [vmem:[#allocation2 + $0x6] sm:$0x7] %vm223_vm8, %v1581_v38  ;;  %v1592_v40 = vunpack.i.h.bf16 %v1590_v39  ;;  %v1591_v41 = vunpack.i.l.bf16 %v1590_v39  ;;  %vm1108_vm8 = vcmask 122976  }
  0x9a   : > { %519 = vst.msk [vmem:[#allocation2 + $0xa] sm:$0x1c] %vm518_vm13, %v1592_v40 }
  0x9b   : > { %243 = vst.msk [vmem:[#allocation2 - $0x1] sm:$0xe] %vm242_vm12, %v1591_v41 }
  0x9c   : > { %v1595_v42 = vpop.permute.xlu0 %1594 }
  0x9d   : > { %v1597_v43 = vunpack.i.h.bf16 %v1595_v42  ;;  %v1596_v44 = vunpack.i.l.bf16 %v1595_v42 }
  0x9f   : > { %315 = vst.msk [vmem:[#allocation2 + $0x2] sm:$0xe] %vm242_vm12, %v1596_v44  ;;  %v1600_v45 = vpop.permute.xlu1 %1599 }
  0xa0   : > { %590 = vst.msk [vmem:[#allocation2 + $0xd] sm:$0x1c] %vm518_vm13, %v1597_v43  ;;  %v1602_v46 = vunpack.i.h.bf16 %v1600_v45  ;;  %v1601_v47 = vunpack.i.l.bf16 %v1600_v45 }
  0xa2   : > { %658 = vst.msk [vmem:[#allocation2 + $0x10] sm:$0x1c] %vm518_vm13, %v1602_v46 }
  0xa3   : > { %383 = vst.msk [vmem:[#allocation2 + $0x5] sm:$0xe] %vm242_vm12, %v1601_v47  ;;  %v1605_v48 = vpop.permute.xlu0 %1604 }
  0xa4   : > { %v1607_v49 = vunpack.i.h.bf16 %v1605_v48  ;;  %v1606_v50 = vunpack.i.l.bf16 %v1605_v48 }
  0xa6   : > { %726 = vst.msk [vmem:[#allocation2 + $0x13] sm:$0x1c] %vm518_vm13, %v1607_v49 }
  0xa7   : > { %451 = vst.msk [vmem:[#allocation2 + $0x8] sm:$0xe] %vm242_vm12, %v1606_v50  ;;  %v1610_v51 = vpop.permute.xlu1 %1609 }
  0xa8   : > { %v1612_v52 = vunpack.i.h.bf16 %v1610_v51  ;;  %v1611_v53 = vunpack.i.l.bf16 %v1610_v51 }
  0xaa   : > { %262 = vst.msk [vmem:[#allocation2 - $0x2] sm:$0x1c] %vm261_vm14, %v1611_v53 }
  0xab   : > { %537 = vst.msk [vmem:[#allocation2 + $0x9] sm:$0x38] %vm536_vm15, %v1612_v52  ;;  %v1615_v54 = vpop.permute.xlu0 %1614 }
  0xac   : > { %v1617_v55 = vunpack.i.h.bf16 %v1615_v54  ;;  %v1616_v56 = vunpack.i.l.bf16 %v1615_v54 }
  0xae   : > { %332 = vst.msk [vmem:[#allocation2 + $0x1] sm:$0x1c] %vm261_vm14, %v1616_v56  ;;  %v1620_v57 = vpop.permute.xlu1 %1619 }
  0xaf   : > { %607 = vst.msk [vmem:[#allocation2 + $0xc] sm:$0x38] %vm536_vm15, %v1617_v55  ;;  %v1622_v58 = vunpack.i.h.bf16 %v1620_v57  ;;  %v1621_v59 = vunpack.i.l.bf16 %v1620_v57 }
  0xb1   : > { %400 = vst.msk [vmem:[#allocation2 + $0x4] sm:$0x1c] %vm261_vm14, %v1621_v59 }
  0xb2   : > { %675 = vst.msk [vmem:[#allocation2 + $0xf] sm:$0x38] %vm536_vm15, %v1622_v58  ;;  %v1625_v60 = vpop.permute.xlu0 %1624 }
  0xb3   : > { %v1627_v61 = vunpack.i.h.bf16 %v1625_v60  ;;  %v1626_v62 = vunpack.i.l.bf16 %v1625_v60 }
  0xb5   : > { %468 = vst.msk [vmem:[#allocation2 + $0x7] sm:$0x1c] %vm261_vm14, %v1626_v62 }
  0xb6   : > { %743 = vst.msk [vmem:[#allocation2 + $0x12] sm:$0x38] %vm536_vm15, %v1627_v61  ;;  %v1630_v63 = vpop.permute.xlu1 %1629 }
  0xb7   : > { %v1632_v0 = vunpack.i.h.bf16 %v1630_v63  ;;  %v1631_v1 = vunpack.i.l.bf16 %v1630_v63 }
  0xb9   : > { %281 = vst.msk [vmem:[#allocation2 - $0x3] sm:$0x38] %vm280_vm0, %v1631_v1 }
  0xba   : > { %556 = vst.msk [vmem:[#allocation2 + $0x8] sm:$0x70] %vm555_vm1, %v1632_v0  ;;  %v1635_v2 = vpop.permute.xlu0 %1634 }
  0xbb   : > { %v1637_v3 = vunpack.i.h.bf16 %v1635_v2  ;;  %v1636_v4 = vunpack.i.l.bf16 %v1635_v2 }
  0xbd   : > { %349 = vst.msk [vmem:[#allocation2] sm:$0x38] %vm280_vm0, %v1636_v4  ;;  %v1640_v5 = vpop.permute.xlu1 %1639 }
  0xbe   : > { %624 = vst.msk [vmem:[#allocation2 + $0xb] sm:$0x70] %vm555_vm1, %v1637_v3  ;;  %v1642_v6 = vunpack.i.h.bf16 %v1640_v5  ;;  %v1641_v7 = vunpack.i.l.bf16 %v1640_v5  ;;  %v1323_v5 = vld [vmem:[%s2234_s1] sm:$0xff] }
  0xc0   : > { %417 = vst.msk [vmem:[#allocation2 + $0x3] sm:$0x38] %vm280_vm0, %v1641_v7 }
  0xc1   : > { %692 = vst.msk [vmem:[#allocation2 + $0xe] sm:$0x70] %vm555_vm1, %v1642_v6  ;;  %v1645_v8 = vpop.permute.xlu0 %1644 }
  0xc2   : > { %v1647_v9 = vunpack.i.h.bf16 %v1645_v8  ;;  %v1646_v10 = vunpack.i.l.bf16 %v1645_v8 }
  0xc4   : > { %485 = vst.msk [vmem:[#allocation2 + $0x6] sm:$0x38] %vm280_vm0, %v1646_v10 }
  0xc5   : > { %760 = vst.msk [vmem:[#allocation2 + $0x11] sm:$0x70] %vm555_vm1, %v1647_v9  ;;  %v1650_v11 = vpop.permute.xlu1 %1649 }
  0xc6   : > { %v1652_v12 = vunpack.i.h.bf16 %v1650_v11  ;;  %v1651_v13 = vunpack.i.l.bf16 %v1650_v11 }
  0xc7   : > { %v1324_v18 = vld [vmem:[#allocation2] sm:$0xff] }
  0xc8   : > { %1126 = vst.msk [vmem:[#allocation2 + $0x24] sm:$0x38] %vm1050_vm11, %v1652_v12 }
  0xc9   : > { %848 = vst.msk [vmem:[#allocation2 + $0x19] sm:$0x1c] %vm775_vm9, %v1651_v13  ;;  %v1655_v14 = vpop.permute.xlu0 %1654 }
  0xca   : > { %v1657_v15 = vunpack.i.h.bf16 %v1655_v14  ;;  %v1656_v16 = vunpack.i.l.bf16 %v1655_v14 }
  0xcb   : > { %v1325_v19 = vld [vmem:[#allocation2 + $0x8] sm:$0xff] }
  0xcc   : > { %1197 = vst.msk [vmem:[#allocation2 + $0x27] sm:$0x38] %vm1050_vm11, %v1657_v15  ;;  %v1660_v20 = vpop.permute.xlu1 %1659  ;;  %v1537_v21 = vpack.c.bf16 %v1325_v19, %v1324_v18  ;;  %v1326_v54 = vld [vmem:[#allocation2 + $0x10] sm:$0xff] }
  0xcd   : > { %916 = vst.msk [vmem:[#allocation2 + $0x1c] sm:$0x1c] %vm775_vm9, %v1656_v16  ;;  %v1662_v22 = vunpack.i.h.bf16 %v1660_v20  ;;  %v1661_v23 = vunpack.i.l.bf16 %v1660_v20 }
  0xce   : > { %1538 = vmatpush3.bf16.msra.mxu0 %v1537_v21 }
  0xcf   : > { %794 = vst.msk [vmem:[#allocation2 + $0x15] sm:$0x38] %vm793_vm2, %v1661_v23  ;;  %1539 = vmatprep.subr.bf16.mxu0 %v1751_v17 }
  0xd0   : > { %1069 = vst.msk [vmem:[#allocation2 + $0x20] sm:$0x70] %vm1068_vm3, %v1662_v22  ;;  %v1665_v24 = vpop.permute.xlu0 %1664 }
  0xd1   : > { %v1667_v25 = vunpack.i.h.bf16 %v1665_v24  ;;  %v1666_v26 = vunpack.i.l.bf16 %v1665_v24 }
  0xd3   : > { %865 = vst.msk [vmem:[#allocation2 + $0x18] sm:$0x38] %vm793_vm2, %v1666_v26 }
  0xd4   : > { %1143 = vst.msk [vmem:[#allocation2 + $0x23] sm:$0x70] %vm1068_vm3, %v1667_v25  ;;  %v1670_v27 = vpop.permute.xlu1 %1669 }
  0xd5   : > { %v1672_v28 = vunpack.i.h.bf16 %v1670_v27  ;;  %v1671_v29 = vunpack.i.l.bf16 %v1670_v27 }
  0xd7   : > { %933 = vst.msk [vmem:[#allocation2 + $0x1b] sm:$0x38] %vm793_vm2, %v1671_v29 }
  0xd8   : > { %1214 = vst.msk [vmem:[#allocation2 + $0x26] sm:$0x70] %vm1068_vm3, %v1672_v28  ;;  %v1675_v30 = vpop.permute.xlu0 %1674 }
  0xd9   : > { %v1677_v31 = vunpack.i.h.bf16 %v1675_v30  ;;  %v1676_v32 = vunpack.i.l.bf16 %v1675_v30 }
  0xdb   : > { %812 = vst.msk [vmem:[#allocation2 + $0x14] sm:$0x70] %vm811_vm4, %v1676_v32  ;;  %v1680_v33 = vpop.permute.xlu1 %1679 }
  0xdc   : > { %1087 = vst.msk [vmem:[#allocation2 + $0x1f] sm:$0xe0] %vm1086_vm5, %v1677_v31  ;;  %v1682_v34 = vunpack.i.h.bf16 %v1680_v33  ;;  %v1681_v35 = vunpack.i.l.bf16 %v1680_v33 }
  0xde   : > { %882 = vst.msk [vmem:[#allocation2 + $0x17] sm:$0x70] %vm811_vm4, %v1681_v35 }
  0xdf   : > { %1160 = vst.msk [vmem:[#allocation2 + $0x22] sm:$0xe0] %vm1086_vm5, %v1682_v34  ;;  %v1685_v36 = vpop.permute.xlu0 %1684 }
  0xe0   : > { %v1687_v37 = vunpack.i.h.bf16 %v1685_v36  ;;  %v1686_v38 = vunpack.i.l.bf16 %v1685_v36 }
  0xe2   : > { %950 = vst.msk [vmem:[#allocation2 + $0x1a] sm:$0x70] %vm811_vm4, %v1686_v38  ;;  %v1690_v39 = vpop.permute.xlu1 %1689 }
  0xe3   : > { %1231 = vst.msk [vmem:[#allocation2 + $0x25] sm:$0xe0] %vm1086_vm5, %v1687_v37  ;;  %v1692_v40 = vunpack.i.h.bf16 %v1690_v39  ;;  %v1691_v41 = vunpack.i.l.bf16 %v1690_v39 }
  0xe5   : > { %831 = vst.msk [vmem:[#allocation2 + $0x13] sm:$0xe0] %vm830_vm6, %v1691_v41  ;;  %v1695_v42 = vpop.permute.xlu0 %1694 }
  0xe6   : > { %1107 = vst.msk [vmem:[#allocation2 + $0x1e] sm:$0xc0] %vm1106_vm7, %v1692_v40  ;;  %v1697_v43 = vunpack.i.h.bf16 %v1695_v42  ;;  %v1696_v44 = vunpack.i.l.bf16 %v1695_v42 }
  0xe8   : > { %899 = vst.msk [vmem:[#allocation2 + $0x16] sm:$0xe0] %vm830_vm6, %v1696_v44  ;;  %v1700_v45 = vpop.permute.xlu1 %1699 }
  0xe9   : > { %1179 = vst.msk [vmem:[#allocation2 + $0x21] sm:$0xc0] %vm1106_vm7, %v1697_v43  ;;  %v1702_v46 = vunpack.i.h.bf16 %v1700_v45  ;;  %v1701_v47 = vunpack.i.l.bf16 %v1700_v45 }
  0xeb   : > { %967 = vst.msk [vmem:[#allocation2 + $0x19] sm:$0xe0] %vm830_vm6, %v1701_v47 }
  0xec   : > { %1250 = vst.msk [vmem:[#allocation2 + $0x24] sm:$0xc0] %vm1106_vm7, %v1702_v46  ;;  %v1705_v48 = vpop.permute.xlu0 %1704 }
  0xed   : > { %v1707_v49 = vunpack.i.h.bf16 %v1705_v48  ;;  %v1706_v50 = vunpack.i.l.bf16 %v1705_v48 }
  0xef   : > { %1268 = vst.msk [vmem:[#allocation2 + $0x2a] sm:$0x38] %vm1050_vm11, %v1707_v49 }
  0xf0   : > { %984 = vst.msk [vmem:[#allocation2 + $0x1f] sm:$0x1c] %vm775_vm9, %v1706_v50  ;;  %v1710_v51 = vpop.permute.xlu1 %1709  ;;  %vm1336_vm9 = vcmask 392192  }
  0xf1   : > { %v1712_v52 = vunpack.i.h.bf16 %v1710_v51  ;;  %v1711_v53 = vunpack.i.l.bf16 %v1710_v51 }
  0xf2   : > { %v1327_v55 = vld [vmem:[#allocation2 + $0x18] sm:$0xff] }
  0xf3   : > { %1001 = vst.msk [vmem:[#allocation2 + $0x1e] sm:$0x38] %vm793_vm2, %v1711_v53  ;;  %v1715_v56 = vpop.permute.xlu0 %1714  ;;  %v1540_v57 = vpack.c.bf16 %v1327_v55, %v1326_v54 }
  0xf4   : > { %1285 = vst.msk [vmem:[#allocation2 + $0x29] sm:$0x70] %vm1068_vm3, %v1712_v52  ;;  %v1717_v58 = vunpack.i.h.bf16 %v1715_v56  ;;  %v1716_v59 = vunpack.i.l.bf16 %v1715_v56 }
  0xf5   : > { %1541 = vmatpush3.bf16.msra.mxu0 %v1540_v57 }
  0xf6   : > { %1018 = vst.msk [vmem:[#allocation2 + $0x1d] sm:$0x70] %vm811_vm4, %v1716_v59  ;;  %v1720_v60 = vpop.permute.xlu1 %1719  ;;  %1542 = vmatprep.subr.bf16.mxu0 %v1751_v17 }
  0xf7   : > { %1302 = vst.msk [vmem:[#allocation2 + $0x28] sm:$0xe0] %vm1086_vm5, %v1717_v58  ;;  %v1722_v61 = vunpack.i.h.bf16 %v1720_v60  ;;  %v1721_v62 = vunpack.i.l.bf16 %v1720_v60  ;;  %v1103_v63 = vpop.permute.xlu0 %1102 }
  0xf8   : > { %1109 = vst.msk [vmem:[#allocation2 + $0x26] sm:$0x1] %vm1108_vm8, %v1103_v63 }
  0xf9   : > { %1035 = vst.msk [vmem:[#allocation2 + $0x1c] sm:$0xe0] %vm830_vm6, %v1721_v62 }
  0xfa   : > { %1321 = vst.msk [vmem:[#allocation2 + $0x27] sm:$0xc0] %vm1106_vm7, %v1722_v61  ;;  %v1176_v0 = vpop.permute.xlu1 %1175 }
  0xfb   : > { %1180 = vst.msk [vmem:[#allocation2 + $0x29] sm:$0x1] %vm1108_vm8, %v1176_v0  ;;  %v1247_v1 = vpop.permute.xlu0 %1246 }
  0xfc   : > { %1251 = vst.msk [vmem:[#allocation2 + $0x2c] sm:$0x1] %vm1108_vm8, %v1247_v1 }
  0xfe   : > { %v1318_v2 = vpop.permute.xlu1 %1317 }
  0xff   : > { %1322 = vst.msk [vmem:[#allocation2 + $0x2f] sm:$0x1] %vm1108_vm8, %v1318_v2 }
 0x100   : > { %v1328_v3 = vld [vmem:[#allocation2 + $0x20] sm:$0xff] }
 0x106   : > { %v1329_v17 = vld [vmem:[#allocation2 + $0x28] sm:$0xff] }
 0x107   : > { %v1543_v4 = vpack.c.bf16 %v1329_v17, %v1328_v3 }
 0x109   : > { %1544 = vmatpush3.bf16.msra.mxu0 %v1543_v4 }
 0x10c   : > { %1534 = vmatmul.mubr.msk.f32.vlgmr.msra.gmra.mrb[0].mxu0 %vm1336_vm9, %v1323_v5  ;;  %v1334_v6 = vpop.permute.xlu0 %1333 }
 0x1df   : > { %v1406_v7 = vpop.f32.mrb[0].mxu0 }
 0x1e0   : > { %v1407_v8 = vadd.f32 %v1406_v7, %v1334_v6  ;;  %v1535_v9 = vpop.f32.mrb[1].mxu0 }
 0x1e2   : > { %v1410_v10 = vsub.f32 0.0, %v1407_v8 }
 0x1e4   : > { %v1411_v11 = vmul.f32 1.442695, %v1410_v10 }
 0x1e6   : > { %1724 = vpow2.f32 %v1411_v11 }
 0x1f0   : > { %v1725_v12 = vpop.eup %1724 }
 0x1f1   : > { %v1413_v13 = vadd.f32 1.0, %v1725_v12 }
 0x1f3   : > { %1726 = vrcp.f32 %v1413_v13 }
 0x1fd   : > { %v1727_v14 = vpop.eup %1726 }
 0x1fe   : > { %1416 = vst.msk [vmem:[%s206_s19] sm:$0xff] %vm1415_vm10, %v1727_v14  ;;  %v1417_v15 = vmul.f32 %v1727_v14, %v1407_v8 }
 0x200   : > { %1418 = vst.msk [vmem:[%s202_s22] sm:$0xff] %vm1415_vm10, %v1417_v15 }
 0x201 PF: > { %s15_s15 = sadd.s32 1, %s1734_s15  }
 0x202   : > { %p12_p4 = scmp.ge.s32.totalorder %s15_s15, 4  }
 0x204   :  { %14 = sbr.rel (!%p12_p4) target bundleno = 1 (0x1), region = 74 }

</bundles_post_ra>
